<compile_context>
chip_gen: v7x
topology: tpu7x:2x2x1
jax: 0.10.0
libtpu: 0.0.40
codegen_flags: <defaults>
</compile_context>

<pallas_src>
import math
import jax
import jax.numpy as jnp
from jax.experimental import pallas as pl
from jax.experimental.pallas import tpu as pltpu

# ---------------- configuration (small, consistent with the module) ----------
B = 2                      # batch
N = 8                      # tokens
C = 32                     # dim
NUM_HEADS = 4
HEAD_DIM = C // NUM_HEADS
MLP_HIDDEN = int(C * 2.0)  # mlp_ratio = 2.0
SCALE = HEAD_DIM ** (-0.5)
EPS = 1e-5                 # nn.LayerNorm default eps
INV_SQRT2 = 1.0 / math.sqrt(2.0)


def _layernorm_core(x):
    # Normalization only: gamma/beta are folded into the downstream weights on the host.
    mu = jnp.mean(x, axis=-1, keepdims=True)
    var = jnp.mean((x - mu) * (x - mu), axis=-1, keepdims=True)
    return (x - mu) * jax.lax.rsqrt(var + EPS)


def block_kernel(x_ref,
                 wq_ref, wk_ref, wv_ref,   # (H, C, hd)  gamma1 (+ scale for Q) folded in
                 bq_ref, bk_ref, bv_ref,   # (H, 1, hd)  beta1 contribution (+ scale for Q)
                 wp_ref, bp_ref,           # (H, hd, C), (1, C)   per-head projection
                 w1_ref, b1_ref,           # (C, Hm), (1, Hm)     gamma2/beta2 folded in
                 w2_ref, b2_ref,           # (Hm, C), (1, C)
                 o_ref):
    bb = x_ref.shape[0]

    # hoist weight loads out of the (static) batch loop
    wq = wq_ref[...]; wk = wk_ref[...]; wv = wv_ref[...]
    bq = bq_ref[...]; bk = bk_ref[...]; bv = bv_ref[...]
    wp = wp_ref[...]; bp = bp_ref[0]
    w1 = w1_ref[...]; b1 = b1_ref[0]
    w2 = w2_ref[...]; b2 = b2_ref[0]

    for b in range(bb):                                    # static unroll (bb is tiny)
        x = x_ref[b].astype(jnp.float32)                   # (N, C)

        # ---- attention branch: attn(norm1(x)) -----------------------------
        nrm = _layernorm_core(x)                           # (N, C)
        nrm_h = jnp.broadcast_to(nrm, (NUM_HEADS, N, C))   # (H, N, C), cheap replicate

        q = jnp.einsum('hnc,hcd->hnd', nrm_h, wq,
                       preferred_element_type=jnp.float32) + bq
        k = jnp.einsum('hnc,hcd->hnd', nrm_h, wk,
                       preferred_element_type=jnp.float32) + bk
        v = jnp.einsum('hnc,hcd->hnd', nrm_h, wv,
                       preferred_element_type=jnp.float32) + bv

        s = jnp.einsum('hnd,hmd->hnm', q, k,
                       preferred_element_type=jnp.float32)  # scale already folded into Q
        s = s - jnp.max(s, axis=-1, keepdims=True)
        p = jnp.exp(s)
        p = p * pl.reciprocal(jnp.sum(p, axis=-1, keepdims=True), approx=True)
        o = jnp.einsum('hnm,hmd->hnd', p, v,
                       preferred_element_type=jnp.float32)  # (H, N, hd)

        # per-head projection + sum over heads (replaces concat + (C,C) matmul)
        attn = jnp.einsum('hnd,hdc->hnc', o, wp,
                          preferred_element_type=jnp.float32)
        attn = jnp.sum(attn, axis=0) + bp                  # (N, C)
        x1 = x + attn                                      # residual 1 (DropPath = identity)

        # ---- MLP branch: mlp(norm2(x1)) ------------------------------------
        nrm2 = _layernorm_core(x1)
        h1 = jnp.dot(nrm2, w1, preferred_element_type=jnp.float32) + b1
        # exact erf GELU, matching torch.nn.GELU default
        h1 = 0.5 * h1 * (1.0 + jax.lax.erf(h1 * INV_SQRT2))
        h2 = jnp.dot(h1, w2, preferred_element_type=jnp.float32) + b2

        o_ref[b] = (x1 + h2).astype(o_ref.dtype)           # residual 2


def _prepare_kernel_params(params):
    """Host-side (one-time) weight folding / re-layout. Raw params are PyTorch-layout."""
    g1, be1, wqkv, wproj, bproj, g2, be2, w1, b1, w2, b2 = params
    g1 = g1.reshape(C); be1 = be1.reshape(C)
    g2 = g2.reshape(C); be2 = be2.reshape(C)

    wq, wk, wv = wqkv[:C], wqkv[C:2 * C], wqkv[2 * C:]     # each (C_out, C_in)

    def fold_heads(w, scale):
        # y = (nrm*g1 + be1) @ w.T  ==  nrm @ (w.T * g1[:,None]) + be1 @ w.T
        w_t = (w.T * g1[:, None]) * scale                  # (C_in, C_out)
        bias = (be1 @ w.T) * scale                         # (C_out,)
        w_h = w_t.reshape(C, NUM_HEADS, HEAD_DIM).transpose(1, 0, 2)   # (H, C, hd)
        b_h = bias.reshape(NUM_HEADS, 1, HEAD_DIM)                     # (H, 1, hd)
        return w_h, b_h

    wq_h, bq_h = fold_heads(wq, SCALE)    # attention scale folded into Q
    wk_h, bk_h = fold_heads(wk, 1.0)
    wv_h, bv_h = fold_heads(wv, 1.0)

    wp_h = wproj.T.reshape(NUM_HEADS, HEAD_DIM, C)         # (H, hd, C)
    bp = bproj.reshape(1, C)

    w1_t = w1.T * g2[:, None]                              # (C, Hm), gamma2 folded
    b1_f = (be2 @ w1.T + b1.reshape(-1)).reshape(1, MLP_HIDDEN)
    w2_t = w2.T                                            # (Hm, C)
    b2_f = b2.reshape(1, C)

    return (wq_h, wk_h, wv_h, bq_h, bk_h, bv_h, wp_h, bp, w1_t, b1_f, w2_t, b2_f)


def block_forward(x, params, batch_per_step=None):
    """batch_per_step: batch elements per grid step.
       default (=B): whole batch in one step -> best on single-TC v5e/v6e.
       on v7x pass batch_per_step=1 so the parallel batch axis spans both TensorCores."""
    bb = B if batch_per_step is None else batch_per_step
    assert B % bb == 0
    kp = _prepare_kernel_params(params)

    def const_spec(a):
        if a.ndim == 3:
            return pl.BlockSpec(a.shape, lambda i: (0, 0, 0))
        return pl.BlockSpec(a.shape, lambda i: (0, 0))

    return pl.pallas_call(
        block_kernel,
        out_shape=jax.ShapeDtypeStruct((B, N, C), x.dtype),
        grid_spec=pltpu.PrefetchScalarGridSpec(
            num_scalar_prefetch=0,
            grid=(B // bb,),
            in_specs=[pl.BlockSpec((bb, N, C), lambda i: (i, 0, 0))]
                     + [const_spec(a) for a in kp],
            out_specs=pl.BlockSpec((bb, N, C), lambda i: (i, 0, 0)),
        ),
        compiler_params=pltpu.CompilerParams(
            dimension_semantics=("parallel",)),
    )(x, *kp)


# ---------------- pure-JAX reference (raw PyTorch-layout params) --------------
def block_reference(x, params):
    (g1, be1, wqkv, wproj, bproj, g2, be2, w1, b1, w2, b2) = params

    def ln(z, g, b):
        mu = jnp.mean(z, axis=-1, keepdims=True)
        var = jnp.mean((z - mu) ** 2, axis=-1, keepdims=True)
        return (z - mu) / jnp.sqrt(var + EPS) * g + b

    xn = ln(x, g1[0], be1[0])
    qkv = xn @ wqkv.T                                      # (B, N, 3C)
    qkv = qkv.reshape(B, N, 3, NUM_HEADS, HEAD_DIM).transpose(2, 0, 3, 1, 4)
    q, k, v = qkv[0], qkv[1], qkv[2]                       # (B, H, N, hd)
    attn = jnp.einsum('bhnd,bhmd->bhnm', q, k) * SCALE
    attn = jax.nn.softmax(attn, axis=-1)
    out = jnp.einsum('bhnm,bhmd->bhnd', attn, v)
    out = out.transpose(0, 2, 1, 3).reshape(B, N, C)
    out = out @ wproj.T + bproj[0]
    x1 = x + out
    x2n = ln(x1, g2[0], be2[0])
    h = x2n @ w1.T + b1[0]
    h = jax.nn.gelu(h, approximate=False)
    h = h @ w2.T + b2[0]
    return x1 + h


if __name__ == "__main__":
    key = jax.random.PRNGKey(0)
    ks = jax.random.split(key, 16)

    x = jax.random.normal(ks[0], (B, N, C), dtype=jnp.float32)

    def init(k, shape, fan_in):
        bound = 1.0 / math.sqrt(fan_in)
        return jax.random.uniform(k, shape, jnp.float32, -bound, bound)

    # Non-trivial LayerNorm affine params so the host-side folding is exercised.
    params = (
        1.0 + 0.1 * jax.random.normal(ks[8], (1, C), jnp.float32),   # norm1 gamma
        0.1 * jax.random.normal(ks[9], (1, C), jnp.float32),         # norm1 beta
        init(ks[1], (3 * C, C), C),                                  # qkv weight (qkv_bias=False)
        init(ks[2], (C, C), C),                                      # proj weight
        init(ks[3], (1, C), C),                                      # proj bias
        1.0 + 0.1 * jax.random.normal(ks[10], (1, C), jnp.float32),  # norm2 gamma
        0.1 * jax.random.normal(ks[11], (1, C), jnp.float32),        # norm2 beta
        init(ks[4], (MLP_HIDDEN, C), C),                             # fc1 weight
        init(ks[5], (1, MLP_HIDDEN), C),                             # fc1 bias
        init(ks[6], (C, MLP_HIDDEN), MLP_HIDDEN),                    # fc2 weight
        init(ks[7], (1, C), MLP_HIDDEN),                             # fc2 bias
    )

    out = block_forward(x, params)
    out = jax.block_until_ready(out)

    ref = block_reference(x, params)
    # tolerance loosened slightly vs exact math: softmax uses EUP approx reciprocal
    assert jnp.allclose(out, ref, rtol=5e-3, atol=5e-3), "mismatch vs reference"

    print("KERNEL_OK")
</pallas_src>

<mosaic_0001>
module attributes {stable_mosaic.version = 11 : i64} {
  func.func @block_kernel(%arg0: i32, %arg1: memref<2x8x32xf32, #tpu.memory_space<vmem>>, %arg2: memref<4x32x8xf32, #tpu.memory_space<vmem>>, %arg3: memref<4x32x8xf32, #tpu.memory_space<vmem>>, %arg4: memref<4x32x8xf32, #tpu.memory_space<vmem>>, %arg5: memref<4x1x8xf32, #tpu.memory_space<vmem>>, %arg6: memref<4x1x8xf32, #tpu.memory_space<vmem>>, %arg7: memref<4x1x8xf32, #tpu.memory_space<vmem>>, %arg8: memref<4x8x32xf32, #tpu.memory_space<vmem>>, %arg9: memref<1x32xf32, #tpu.memory_space<vmem>>, %arg10: memref<32x64xf32, #tpu.memory_space<vmem>>, %arg11: memref<1x64xf32, #tpu.memory_space<vmem>>, %arg12: memref<64x32xf32, #tpu.memory_space<vmem>>, %arg13: memref<1x32xf32, #tpu.memory_space<vmem>>, %arg14: memref<2x8x32xf32, #tpu.memory_space<vmem>>) attributes {dimension_semantics = [#tpu.dimension_semantics<parallel>], iteration_bounds = array<i64: 1>, scalar_prefetch = 0 : i64, scratch_operands = 0 : i64, tpu.core_type = #tpu.core_type<tc>, window_params = [{transform_indices = @transform_0, window_bounds = array<i64: 2, 8, 32>}, {pipeline_mode = #tpu.pipeline_mode<synchronous>, transform_indices = @transform_1, window_bounds = array<i64: 4, 32, 8>}, {pipeline_mode = #tpu.pipeline_mode<synchronous>, transform_indices = @transform_2, window_bounds = array<i64: 4, 32, 8>}, {pipeline_mode = #tpu.pipeline_mode<synchronous>, transform_indices = @transform_3, window_bounds = array<i64: 4, 32, 8>}, {pipeline_mode = #tpu.pipeline_mode<synchronous>, transform_indices = @transform_4, window_bounds = array<i64: 4, 1, 8>}, {pipeline_mode = #tpu.pipeline_mode<synchronous>, transform_indices = @transform_5, window_bounds = array<i64: 4, 1, 8>}, {pipeline_mode = #tpu.pipeline_mode<synchronous>, transform_indices = @transform_6, window_bounds = array<i64: 4, 1, 8>}, {pipeline_mode = #tpu.pipeline_mode<synchronous>, transform_indices = @transform_7, window_bounds = array<i64: 4, 8, 32>}, {pipeline_mode = #tpu.pipeline_mode<synchronous>, transform_indices = @transform_8, window_bounds = array<i64: 1, 32>}, {pipeline_mode = #tpu.pipeline_mode<synchronous>, transform_indices = @transform_9, window_bounds = array<i64: 32, 64>}, {pipeline_mode = #tpu.pipeline_mode<synchronous>, transform_indices = @transform_10, window_bounds = array<i64: 1, 64>}, {pipeline_mode = #tpu.pipeline_mode<synchronous>, transform_indices = @transform_11, window_bounds = array<i64: 64, 32>}, {pipeline_mode = #tpu.pipeline_mode<synchronous>, transform_indices = @transform_12, window_bounds = array<i64: 1, 32>}, {transform_indices = @transform_13, window_bounds = array<i64: 2, 8, 32>}]} {
    %c0 = arith.constant 0 : index
    %c0_0 = arith.constant 0 : index
    %c0_1 = arith.constant 0 : index
    %0 = vector.load %arg2[%c0, %c0_0, %c0_1] : memref<4x32x8xf32, #tpu.memory_space<vmem>>, vector<4x32x8xf32>
    %c0_2 = arith.constant 0 : index
    %c0_3 = arith.constant 0 : index
    %c0_4 = arith.constant 0 : index
    %1 = vector.load %arg3[%c0_2, %c0_3, %c0_4] : memref<4x32x8xf32, #tpu.memory_space<vmem>>, vector<4x32x8xf32>
    %c0_5 = arith.constant 0 : index
    %c0_6 = arith.constant 0 : index
    %c0_7 = arith.constant 0 : index
    %2 = vector.load %arg4[%c0_5, %c0_6, %c0_7] : memref<4x32x8xf32, #tpu.memory_space<vmem>>, vector<4x32x8xf32>
    %c0_8 = arith.constant 0 : index
    %c0_9 = arith.constant 0 : index
    %c0_10 = arith.constant 0 : index
    %3 = vector.load %arg5[%c0_8, %c0_9, %c0_10] : memref<4x1x8xf32, #tpu.memory_space<vmem>>, vector<4x1x8xf32>
    %c0_11 = arith.constant 0 : index
    %c0_12 = arith.constant 0 : index
    %c0_13 = arith.constant 0 : index
    %4 = vector.load %arg6[%c0_11, %c0_12, %c0_13] : memref<4x1x8xf32, #tpu.memory_space<vmem>>, vector<4x1x8xf32>
    %c0_14 = arith.constant 0 : index
    %c0_15 = arith.constant 0 : index
    %c0_16 = arith.constant 0 : index
    %5 = vector.load %arg7[%c0_14, %c0_15, %c0_16] : memref<4x1x8xf32, #tpu.memory_space<vmem>>, vector<4x1x8xf32>
    %c0_17 = arith.constant 0 : index
    %c0_18 = arith.constant 0 : index
    %c0_19 = arith.constant 0 : index
    %6 = vector.load %arg8[%c0_17, %c0_18, %c0_19] : memref<4x8x32xf32, #tpu.memory_space<vmem>>, vector<4x8x32xf32>
    %c0_20 = arith.constant 0 : index
    %c0_21 = arith.constant 0 : index
    %7 = vector.load %arg9[%c0_20, %c0_21] : memref<1x32xf32, #tpu.memory_space<vmem>>, vector<1x32xf32>
    %8 = vector.shape_cast %7 : vector<1x32xf32> to vector<32xf32>
    %c0_22 = arith.constant 0 : index
    %c0_23 = arith.constant 0 : index
    %9 = vector.load %arg10[%c0_22, %c0_23] : memref<32x64xf32, #tpu.memory_space<vmem>>, vector<32x64xf32>
    %c0_24 = arith.constant 0 : index
    %c0_25 = arith.constant 0 : index
    %10 = vector.load %arg11[%c0_24, %c0_25] : memref<1x64xf32, #tpu.memory_space<vmem>>, vector<1x64xf32>
    %11 = vector.shape_cast %10 : vector<1x64xf32> to vector<64xf32>
    %c0_26 = arith.constant 0 : index
    %c0_27 = arith.constant 0 : index
    %12 = vector.load %arg12[%c0_26, %c0_27] : memref<64x32xf32, #tpu.memory_space<vmem>>, vector<64x32xf32>
    %c0_28 = arith.constant 0 : index
    %c0_29 = arith.constant 0 : index
    %13 = vector.load %arg13[%c0_28, %c0_29] : memref<1x32xf32, #tpu.memory_space<vmem>>, vector<1x32xf32>
    %14 = vector.shape_cast %13 : vector<1x32xf32> to vector<32xf32>
    %c0_30 = arith.constant 0 : index
    %c0_31 = arith.constant 0 : index
    %c0_32 = arith.constant 0 : index
    %15 = vector.load %arg1[%c0_30, %c0_31, %c0_32] : memref<2x8x32xf32, #tpu.memory_space<vmem>>, vector<1x8x32xf32>
    %16 = vector.shape_cast %15 : vector<1x8x32xf32> to vector<8x32xf32>
    %cst = arith.constant dense<0.000000e+00> : vector<8xf32>
    %17 = vector.multi_reduction <add>, %16, %cst [1] : vector<8x32xf32> to vector<8xf32>
    %18 = vector.shape_cast %17 : vector<8xf32> to vector<8x1xf32>
    %cst_33 = arith.constant 3.200000e+01 : f32
    %19 = vector.broadcast %cst_33 : f32 to vector<8x1xf32>
    %20 = arith.divf %18, %19 : vector<8x1xf32>
    %21 = vector.broadcast %20 : vector<8x1xf32> to vector<8x32xf32>
    %22 = arith.subf %16, %21 : vector<8x32xf32>
    %23 = vector.broadcast %20 : vector<8x1xf32> to vector<8x32xf32>
    %24 = arith.subf %16, %23 : vector<8x32xf32>
    %25 = arith.mulf %22, %24 : vector<8x32xf32>
    %cst_34 = arith.constant dense<0.000000e+00> : vector<8xf32>
    %26 = vector.multi_reduction <add>, %25, %cst_34 [1] : vector<8x32xf32> to vector<8xf32>
    %27 = vector.shape_cast %26 : vector<8xf32> to vector<8x1xf32>
    %cst_35 = arith.constant 3.200000e+01 : f32
    %28 = vector.broadcast %cst_35 : f32 to vector<8x1xf32>
    %29 = arith.divf %27, %28 : vector<8x1xf32>
    %30 = vector.broadcast %20 : vector<8x1xf32> to vector<8x32xf32>
    %31 = arith.subf %16, %30 : vector<8x32xf32>
    %cst_36 = arith.constant 9.99999974E-6 : f32
    %32 = vector.broadcast %cst_36 : f32 to vector<8x1xf32>
    %33 = arith.addf %29, %32 : vector<8x1xf32>
    %34 = math.rsqrt %33 : vector<8x1xf32>
    %35 = vector.broadcast %34 : vector<8x1xf32> to vector<8x32xf32>
    %36 = arith.mulf %31, %35 : vector<8x32xf32>
    %37 = vector.shape_cast %36 : vector<8x32xf32> to vector<1x8x32xf32>
    %38 = vector.broadcast %37 : vector<1x8x32xf32> to vector<4x8x32xf32>
    "tpu.trace_start"() <{level = 10 : i32, message = "hnc,hcd->hnd"}> : () -> ()
    %cst_37 = arith.constant dense<0.000000e+00> : vector<4x8x8xf32>
    %39 = tpu.matmul %38, %0, %cst_37 {dimension_numbers = #tpu.dot_dimension_numbers<[2], [1], [1], [2], [0, 0, 0, 1, 1, 2], [0], [0]>} : vector<4x8x32xf32>, vector<4x32x8xf32>, vector<4x8x8xf32> -> vector<4x8x8xf32>
    "tpu.trace_stop"() : () -> ()
    %40 = vector.broadcast %3 : vector<4x1x8xf32> to vector<4x8x8xf32>
    %41 = arith.addf %39, %40 : vector<4x8x8xf32>
    "tpu.trace_start"() <{level = 10 : i32, message = "hnc,hcd->hnd"}> : () -> ()
    %cst_38 = arith.constant dense<0.000000e+00> : vector<4x8x8xf32>
    %42 = tpu.matmul %38, %1, %cst_38 {dimension_numbers = #tpu.dot_dimension_numbers<[2], [1], [1], [2], [0, 0, 0, 1, 1, 2], [0], [0]>} : vector<4x8x32xf32>, vector<4x32x8xf32>, vector<4x8x8xf32> -> vector<4x8x8xf32>
    "tpu.trace_stop"() : () -> ()
    %43 = vector.broadcast %4 : vector<4x1x8xf32> to vector<4x8x8xf32>
    %44 = arith.addf %42, %43 : vector<4x8x8xf32>
    "tpu.trace_start"() <{level = 10 : i32, message = "hnc,hcd->hnd"}> : () -> ()
    %cst_39 = arith.constant dense<0.000000e+00> : vector<4x8x8xf32>
    %45 = tpu.matmul %38, %2, %cst_39 {dimension_numbers = #tpu.dot_dimension_numbers<[2], [1], [1], [2], [0, 0, 0, 1, 1, 2], [0], [0]>} : vector<4x8x32xf32>, vector<4x32x8xf32>, vector<4x8x8xf32> -> vector<4x8x8xf32>
    "tpu.trace_stop"() : () -> ()
    %46 = vector.broadcast %5 : vector<4x1x8xf32> to vector<4x8x8xf32>
    %47 = arith.addf %45, %46 : vector<4x8x8xf32>
    "tpu.trace_start"() <{level = 10 : i32, message = "hnd,hmd->hnm"}> : () -> ()
    %cst_40 = arith.constant dense<0.000000e+00> : vector<4x8x8xf32>
    %48 = tpu.matmul %41, %44, %cst_40 {dimension_numbers = #tpu.dot_dimension_numbers<[2], [2], [1], [1], [0, 0, 0, 1, 1, 1], [0], [0]>} : vector<4x8x8xf32>, vector<4x8x8xf32>, vector<4x8x8xf32> -> vector<4x8x8xf32>
    "tpu.trace_stop"() : () -> ()
    %cst_41 = arith.constant dense<0xFF800000> : vector<4x8xf32>
    %49 = vector.multi_reduction <maximumf>, %48, %cst_41 [2] : vector<4x8x8xf32> to vector<4x8xf32>
    %50 = vector.shape_cast %49 : vector<4x8xf32> to vector<4x8x1xf32>
    %51 = vector.broadcast %50 : vector<4x8x1xf32> to vector<4x8x8xf32>
    %52 = arith.subf %48, %51 : vector<4x8x8xf32>
    %53 = math.exp %52 : vector<4x8x8xf32>
    %cst_42 = arith.constant dense<0.000000e+00> : vector<4x8xf32>
    %54 = vector.multi_reduction <add>, %53, %cst_42 [2] : vector<4x8x8xf32> to vector<4x8xf32>
    %55 = vector.shape_cast %54 : vector<4x8xf32> to vector<4x8x1xf32>
    %56 = tpu.reciprocal %55 {approx = true} : vector<4x8x1xf32> -> vector<4x8x1xf32>
    %57 = vector.broadcast %56 : vector<4x8x1xf32> to vector<4x8x8xf32>
    %58 = arith.mulf %53, %57 : vector<4x8x8xf32>
    "tpu.trace_start"() <{level = 10 : i32, message = "hnm,hmd->hnd"}> : () -> ()
    %cst_43 = arith.constant dense<0.000000e+00> : vector<4x8x8xf32>
    %59 = tpu.matmul %58, %47, %cst_43 {dimension_numbers = #tpu.dot_dimension_numbers<[2], [1], [1], [2], [0, 0, 0, 1, 1, 2], [0], [0]>} : vector<4x8x8xf32>, vector<4x8x8xf32>, vector<4x8x8xf32> -> vector<4x8x8xf32>
    "tpu.trace_stop"() : () -> ()
    "tpu.trace_start"() <{level = 10 : i32, message = "hnd,hdc->hnc"}> : () -> ()
    %cst_44 = arith.constant dense<0.000000e+00> : vector<4x8x32xf32>
    %60 = tpu.matmul %59, %6, %cst_44 {dimension_numbers = #tpu.dot_dimension_numbers<[2], [1], [1], [2], [0, 0, 0, 1, 1, 2], [0], [0]>} : vector<4x8x8xf32>, vector<4x8x32xf32>, vector<4x8x32xf32> -> vector<4x8x32xf32>
    "tpu.trace_stop"() : () -> ()
    %cst_45 = arith.constant dense<0.000000e+00> : vector<8x32xf32>
    %61 = vector.multi_reduction <add>, %60, %cst_45 [0] : vector<4x8x32xf32> to vector<8x32xf32>
    %62 = vector.shape_cast %8 : vector<32xf32> to vector<1x32xf32>
    %63 = vector.broadcast %62 : vector<1x32xf32> to vector<8x32xf32>
    %64 = arith.addf %61, %63 : vector<8x32xf32>
    %65 = arith.addf %16, %64 : vector<8x32xf32>
    %cst_46 = arith.constant dense<0.000000e+00> : vector<8xf32>
    %66 = vector.multi_reduction <add>, %65, %cst_46 [1] : vector<8x32xf32> to vector<8xf32>
    %67 = vector.shape_cast %66 : vector<8xf32> to vector<8x1xf32>
    %cst_47 = arith.constant 3.200000e+01 : f32
    %68 = vector.broadcast %cst_47 : f32 to vector<8x1xf32>
    %69 = arith.divf %67, %68 : vector<8x1xf32>
    %70 = vector.broadcast %69 : vector<8x1xf32> to vector<8x32xf32>
    %71 = arith.subf %65, %70 : vector<8x32xf32>
    %72 = vector.broadcast %69 : vector<8x1xf32> to vector<8x32xf32>
    %73 = arith.subf %65, %72 : vector<8x32xf32>
    %74 = arith.mulf %71, %73 : vector<8x32xf32>
    %cst_48 = arith.constant dense<0.000000e+00> : vector<8xf32>
    %75 = vector.multi_reduction <add>, %74, %cst_48 [1] : vector<8x32xf32> to vector<8xf32>
    %76 = vector.shape_cast %75 : vector<8xf32> to vector<8x1xf32>
    %cst_49 = arith.constant 3.200000e+01 : f32
    %77 = vector.broadcast %cst_49 : f32 to vector<8x1xf32>
    %78 = arith.divf %76, %77 : vector<8x1xf32>
    %79 = vector.broadcast %69 : vector<8x1xf32> to vector<8x32xf32>
    %80 = arith.subf %65, %79 : vector<8x32xf32>
    %cst_50 = arith.constant 9.99999974E-6 : f32
    %81 = vector.broadcast %cst_50 : f32 to vector<8x1xf32>
    %82 = arith.addf %78, %81 : vector<8x1xf32>
    %83 = math.rsqrt %82 : vector<8x1xf32>
    %84 = vector.broadcast %83 : vector<8x1xf32> to vector<8x32xf32>
    %85 = arith.mulf %80, %84 : vector<8x32xf32>
    %cst_51 = arith.constant dense<0.000000e+00> : vector<8x64xf32>
    %86 = tpu.matmul %85, %9, %cst_51 {dimension_numbers = #tpu.dot_dimension_numbers<[1], [0], [0], [1], [0, 0, 1, 1], [], []>} : vector<8x32xf32>, vector<32x64xf32>, vector<8x64xf32> -> vector<8x64xf32>
    %87 = vector.shape_cast %11 : vector<64xf32> to vector<1x64xf32>
    %88 = vector.broadcast %87 : vector<1x64xf32> to vector<8x64xf32>
    %89 = arith.addf %86, %88 : vector<8x64xf32>
    %cst_52 = arith.constant 5.000000e-01 : f32
    %90 = vector.broadcast %cst_52 : f32 to vector<8x64xf32>
    %91 = arith.mulf %90, %89 : vector<8x64xf32>
    %cst_53 = arith.constant 0.707106769 : f32
    %92 = vector.broadcast %cst_53 : f32 to vector<8x64xf32>
    %93 = arith.mulf %89, %92 : vector<8x64xf32>
    %94 = math.erf %93 : vector<8x64xf32>
    %cst_54 = arith.constant 1.000000e+00 : f32
    %95 = vector.broadcast %cst_54 : f32 to vector<8x64xf32>
    %96 = arith.addf %95, %94 : vector<8x64xf32>
    %97 = arith.mulf %91, %96 : vector<8x64xf32>
    %cst_55 = arith.constant dense<0.000000e+00> : vector<8x32xf32>
    %98 = tpu.matmul %97, %12, %cst_55 {dimension_numbers = #tpu.dot_dimension_numbers<[1], [0], [0], [1], [0, 0, 1, 1], [], []>} : vector<8x64xf32>, vector<64x32xf32>, vector<8x32xf32> -> vector<8x32xf32>
    %99 = vector.shape_cast %14 : vector<32xf32> to vector<1x32xf32>
    %100 = vector.broadcast %99 : vector<1x32xf32> to vector<8x32xf32>
    %101 = arith.addf %98, %100 : vector<8x32xf32>
    %102 = arith.addf %65, %101 : vector<8x32xf32>
    %c0_56 = arith.constant 0 : index
    %c0_57 = arith.constant 0 : index
    %c0_58 = arith.constant 0 : index
    %103 = vector.load %arg14[%c0_56, %c0_57, %c0_58] : memref<2x8x32xf32, #tpu.memory_space<vmem>>, vector<1x8x32xf32>
    %104 = vector.shape_cast %103 : vector<1x8x32xf32> to vector<8x32xf32>
    %105 = vector.shape_cast %102 : vector<8x32xf32> to vector<1x8x32xf32>
    tpu.vector_store %arg14[%c0_56, %c0_57, %c0_58], %105 {strides = array<i32>} : memref<2x8x32xf32, #tpu.memory_space<vmem>>, vector<1x8x32xf32>,
    %c1 = arith.constant 1 : index
    %c0_59 = arith.constant 0 : index
    %c0_60 = arith.constant 0 : index
    %106 = vector.load %arg1[%c1, %c0_59, %c0_60] : memref<2x8x32xf32, #tpu.memory_space<vmem>>, vector<1x8x32xf32>
    %107 = vector.shape_cast %106 : vector<1x8x32xf32> to vector<8x32xf32>
    %cst_61 = arith.constant dense<0.000000e+00> : vector<8xf32>
    %108 = vector.multi_reduction <add>, %107, %cst_61 [1] : vector<8x32xf32> to vector<8xf32>
    %109 = vector.shape_cast %108 : vector<8xf32> to vector<8x1xf32>
    %cst_62 = arith.constant 3.200000e+01 : f32
    %110 = vector.broadcast %cst_62 : f32 to vector<8x1xf32>
    %111 = arith.divf %109, %110 : vector<8x1xf32>
    %112 = vector.broadcast %111 : vector<8x1xf32> to vector<8x32xf32>
    %113 = arith.subf %107, %112 : vector<8x32xf32>
    %114 = vector.broadcast %111 : vector<8x1xf32> to vector<8x32xf32>
    %115 = arith.subf %107, %114 : vector<8x32xf32>
    %116 = arith.mulf %113, %115 : vector<8x32xf32>
    %cst_63 = arith.constant dense<0.000000e+00> : vector<8xf32>
    %117 = vector.multi_reduction <add>, %116, %cst_63 [1] : vector<8x32xf32> to vector<8xf32>
    %118 = vector.shape_cast %117 : vector<8xf32> to vector<8x1xf32>
    %cst_64 = arith.constant 3.200000e+01 : f32
    %119 = vector.broadcast %cst_64 : f32 to vector<8x1xf32>
    %120 = arith.divf %118, %119 : vector<8x1xf32>
    %121 = vector.broadcast %111 : vector<8x1xf32> to vector<8x32xf32>
    %122 = arith.subf %107, %121 : vector<8x32xf32>
    %cst_65 = arith.constant 9.99999974E-6 : f32
    %123 = vector.broadcast %cst_65 : f32 to vector<8x1xf32>
    %124 = arith.addf %120, %123 : vector<8x1xf32>
    %125 = math.rsqrt %124 : vector<8x1xf32>
    %126 = vector.broadcast %125 : vector<8x1xf32> to vector<8x32xf32>
    %127 = arith.mulf %122, %126 : vector<8x32xf32>
    %128 = vector.shape_cast %127 : vector<8x32xf32> to vector<1x8x32xf32>
    %129 = vector.broadcast %128 : vector<1x8x32xf32> to vector<4x8x32xf32>
    "tpu.trace_start"() <{level = 10 : i32, message = "hnc,hcd->hnd"}> : () -> ()
    %cst_66 = arith.constant dense<0.000000e+00> : vector<4x8x8xf32>
    %130 = tpu.matmul %129, %0, %cst_66 {dimension_numbers = #tpu.dot_dimension_numbers<[2], [1], [1], [2], [0, 0, 0, 1, 1, 2], [0], [0]>} : vector<4x8x32xf32>, vector<4x32x8xf32>, vector<4x8x8xf32> -> vector<4x8x8xf32>
    "tpu.trace_stop"() : () -> ()
    %131 = vector.broadcast %3 : vector<4x1x8xf32> to vector<4x8x8xf32>
    %132 = arith.addf %130, %131 : vector<4x8x8xf32>
    "tpu.trace_start"() <{level = 10 : i32, message = "hnc,hcd->hnd"}> : () -> ()
    %cst_67 = arith.constant dense<0.000000e+00> : vector<4x8x8xf32>
    %133 = tpu.matmul %129, %1, %cst_67 {dimension_numbers = #tpu.dot_dimension_numbers<[2], [1], [1], [2], [0, 0, 0, 1, 1, 2], [0], [0]>} : vector<4x8x32xf32>, vector<4x32x8xf32>, vector<4x8x8xf32> -> vector<4x8x8xf32>
    "tpu.trace_stop"() : () -> ()
    %134 = vector.broadcast %4 : vector<4x1x8xf32> to vector<4x8x8xf32>
    %135 = arith.addf %133, %134 : vector<4x8x8xf32>
    "tpu.trace_start"() <{level = 10 : i32, message = "hnc,hcd->hnd"}> : () -> ()
    %cst_68 = arith.constant dense<0.000000e+00> : vector<4x8x8xf32>
    %136 = tpu.matmul %129, %2, %cst_68 {dimension_numbers = #tpu.dot_dimension_numbers<[2], [1], [1], [2], [0, 0, 0, 1, 1, 2], [0], [0]>} : vector<4x8x32xf32>, vector<4x32x8xf32>, vector<4x8x8xf32> -> vector<4x8x8xf32>
    "tpu.trace_stop"() : () -> ()
    %137 = vector.broadcast %5 : vector<4x1x8xf32> to vector<4x8x8xf32>
    %138 = arith.addf %136, %137 : vector<4x8x8xf32>
    "tpu.trace_start"() <{level = 10 : i32, message = "hnd,hmd->hnm"}> : () -> ()
    %cst_69 = arith.constant dense<0.000000e+00> : vector<4x8x8xf32>
    %139 = tpu.matmul %132, %135, %cst_69 {dimension_numbers = #tpu.dot_dimension_numbers<[2], [2], [1], [1], [0, 0, 0, 1, 1, 1], [0], [0]>} : vector<4x8x8xf32>, vector<4x8x8xf32>, vector<4x8x8xf32> -> vector<4x8x8xf32>
    "tpu.trace_stop"() : () -> ()
    %cst_70 = arith.constant dense<0xFF800000> : vector<4x8xf32>
    %140 = vector.multi_reduction <maximumf>, %139, %cst_70 [2] : vector<4x8x8xf32> to vector<4x8xf32>
    %141 = vector.shape_cast %140 : vector<4x8xf32> to vector<4x8x1xf32>
    %142 = vector.broadcast %141 : vector<4x8x1xf32> to vector<4x8x8xf32>
    %143 = arith.subf %139, %142 : vector<4x8x8xf32>
    %144 = math.exp %143 : vector<4x8x8xf32>
    %cst_71 = arith.constant dense<0.000000e+00> : vector<4x8xf32>
    %145 = vector.multi_reduction <add>, %144, %cst_71 [2] : vector<4x8x8xf32> to vector<4x8xf32>
    %146 = vector.shape_cast %145 : vector<4x8xf32> to vector<4x8x1xf32>
    %147 = tpu.reciprocal %146 {approx = true} : vector<4x8x1xf32> -> vector<4x8x1xf32>
    %148 = vector.broadcast %147 : vector<4x8x1xf32> to vector<4x8x8xf32>
    %149 = arith.mulf %144, %148 : vector<4x8x8xf32>
    "tpu.trace_start"() <{level = 10 : i32, message = "hnm,hmd->hnd"}> : () -> ()
    %cst_72 = arith.constant dense<0.000000e+00> : vector<4x8x8xf32>
    %150 = tpu.matmul %149, %138, %cst_72 {dimension_numbers = #tpu.dot_dimension_numbers<[2], [1], [1], [2], [0, 0, 0, 1, 1, 2], [0], [0]>} : vector<4x8x8xf32>, vector<4x8x8xf32>, vector<4x8x8xf32> -> vector<4x8x8xf32>
    "tpu.trace_stop"() : () -> ()
    "tpu.trace_start"() <{level = 10 : i32, message = "hnd,hdc->hnc"}> : () -> ()
    %cst_73 = arith.constant dense<0.000000e+00> : vector<4x8x32xf32>
    %151 = tpu.matmul %150, %6, %cst_73 {dimension_numbers = #tpu.dot_dimension_numbers<[2], [1], [1], [2], [0, 0, 0, 1, 1, 2], [0], [0]>} : vector<4x8x8xf32>, vector<4x8x32xf32>, vector<4x8x32xf32> -> vector<4x8x32xf32>
    "tpu.trace_stop"() : () -> ()
    %cst_74 = arith.constant dense<0.000000e+00> : vector<8x32xf32>
    %152 = vector.multi_reduction <add>, %151, %cst_74 [0] : vector<4x8x32xf32> to vector<8x32xf32>
    %153 = vector.shape_cast %8 : vector<32xf32> to vector<1x32xf32>
    %154 = vector.broadcast %153 : vector<1x32xf32> to vector<8x32xf32>
    %155 = arith.addf %152, %154 : vector<8x32xf32>
    %156 = arith.addf %107, %155 : vector<8x32xf32>
    %cst_75 = arith.constant dense<0.000000e+00> : vector<8xf32>
    %157 = vector.multi_reduction <add>, %156, %cst_75 [1] : vector<8x32xf32> to vector<8xf32>
    %158 = vector.shape_cast %157 : vector<8xf32> to vector<8x1xf32>
    %cst_76 = arith.constant 3.200000e+01 : f32
    %159 = vector.broadcast %cst_76 : f32 to vector<8x1xf32>
    %160 = arith.divf %158, %159 : vector<8x1xf32>
    %161 = vector.broadcast %160 : vector<8x1xf32> to vector<8x32xf32>
    %162 = arith.subf %156, %161 : vector<8x32xf32>
    %163 = vector.broadcast %160 : vector<8x1xf32> to vector<8x32xf32>
    %164 = arith.subf %156, %163 : vector<8x32xf32>
    %165 = arith.mulf %162, %164 : vector<8x32xf32>
    %cst_77 = arith.constant dense<0.000000e+00> : vector<8xf32>
    %166 = vector.multi_reduction <add>, %165, %cst_77 [1] : vector<8x32xf32> to vector<8xf32>
    %167 = vector.shape_cast %166 : vector<8xf32> to vector<8x1xf32>
    %cst_78 = arith.constant 3.200000e+01 : f32
    %168 = vector.broadcast %cst_78 : f32 to vector<8x1xf32>
    %169 = arith.divf %167, %168 : vector<8x1xf32>
    %170 = vector.broadcast %160 : vector<8x1xf32> to vector<8x32xf32>
    %171 = arith.subf %156, %170 : vector<8x32xf32>
    %cst_79 = arith.constant 9.99999974E-6 : f32
    %172 = vector.broadcast %cst_79 : f32 to vector<8x1xf32>
    %173 = arith.addf %169, %172 : vector<8x1xf32>
    %174 = math.rsqrt %173 : vector<8x1xf32>
    %175 = vector.broadcast %174 : vector<8x1xf32> to vector<8x32xf32>
    %176 = arith.mulf %171, %175 : vector<8x32xf32>
    %cst_80 = arith.constant dense<0.000000e+00> : vector<8x64xf32>
    %177 = tpu.matmul %176, %9, %cst_80 {dimension_numbers = #tpu.dot_dimension_numbers<[1], [0], [0], [1], [0, 0, 1, 1], [], []>} : vector<8x32xf32>, vector<32x64xf32>, vector<8x64xf32> -> vector<8x64xf32>
    %178 = vector.shape_cast %11 : vector<64xf32> to vector<1x64xf32>
    %179 = vector.broadcast %178 : vector<1x64xf32> to vector<8x64xf32>
    %180 = arith.addf %177, %179 : vector<8x64xf32>
    %cst_81 = arith.constant 5.000000e-01 : f32
    %181 = vector.broadcast %cst_81 : f32 to vector<8x64xf32>
    %182 = arith.mulf %181, %180 : vector<8x64xf32>
    %cst_82 = arith.constant 0.707106769 : f32
    %183 = vector.broadcast %cst_82 : f32 to vector<8x64xf32>
    %184 = arith.mulf %180, %183 : vector<8x64xf32>
    %185 = math.erf %184 : vector<8x64xf32>
    %cst_83 = arith.constant 1.000000e+00 : f32
    %186 = vector.broadcast %cst_83 : f32 to vector<8x64xf32>
    %187 = arith.addf %186, %185 : vector<8x64xf32>
    %188 = arith.mulf %182, %187 : vector<8x64xf32>
    %cst_84 = arith.constant dense<0.000000e+00> : vector<8x32xf32>
    %189 = tpu.matmul %188, %12, %cst_84 {dimension_numbers = #tpu.dot_dimension_numbers<[1], [0], [0], [1], [0, 0, 1, 1], [], []>} : vector<8x64xf32>, vector<64x32xf32>, vector<8x32xf32> -> vector<8x32xf32>
    %190 = vector.shape_cast %14 : vector<32xf32> to vector<1x32xf32>
    %191 = vector.broadcast %190 : vector<1x32xf32> to vector<8x32xf32>
    %192 = arith.addf %189, %191 : vector<8x32xf32>
    %193 = arith.addf %156, %192 : vector<8x32xf32>
    %c1_85 = arith.constant 1 : index
    %c0_86 = arith.constant 0 : index
    %c0_87 = arith.constant 0 : index
    %194 = vector.load %arg14[%c1_85, %c0_86, %c0_87] : memref<2x8x32xf32, #tpu.memory_space<vmem>>, vector<1x8x32xf32>
    %195 = vector.shape_cast %194 : vector<1x8x32xf32> to vector<8x32xf32>
    %196 = vector.shape_cast %193 : vector<8x32xf32> to vector<1x8x32xf32>
    tpu.vector_store %arg14[%c1_85, %c0_86, %c0_87], %196 {strides = array<i32>} : memref<2x8x32xf32, #tpu.memory_space<vmem>>, vector<1x8x32xf32>,
    return
  }
  func.func @transform_0(%arg0: i32) -> (i32, i32, i32) {
    %c0_i32 = arith.constant 0 : i32
    %c0_i32_0 = arith.constant 0 : i32
    %c0_i32_1 = arith.constant 0 : i32
    return %arg0, %c0_i32, %c0_i32_0 : i32, i32, i32
  }
  func.func @transform_1(%arg0: i32) -> (i32, i32, i32) {
    %c0_i32 = arith.constant 0 : i32
    %c0_i32_0 = arith.constant 0 : i32
    %c0_i32_1 = arith.constant 0 : i32
    %c0_i32_2 = arith.constant 0 : i32
    return %c0_i32, %c0_i32_0, %c0_i32_1 : i32, i32, i32
  }
  func.func @transform_2(%arg0: i32) -> (i32, i32, i32) {
    %c0_i32 = arith.constant 0 : i32
    %c0_i32_0 = arith.constant 0 : i32
    %c0_i32_1 = arith.constant 0 : i32
    %c0_i32_2 = arith.constant 0 : i32
    return %c0_i32, %c0_i32_0, %c0_i32_1 : i32, i32, i32
  }
  func.func @transform_3(%arg0: i32) -> (i32, i32, i32) {
    %c0_i32 = arith.constant 0 : i32
    %c0_i32_0 = arith.constant 0 : i32
    %c0_i32_1 = arith.constant 0 : i32
    %c0_i32_2 = arith.constant 0 : i32
    return %c0_i32, %c0_i32_0, %c0_i32_1 : i32, i32, i32
  }
  func.func @transform_4(%arg0: i32) -> (i32, i32, i32) {
    %c0_i32 = arith.constant 0 : i32
    %c0_i32_0 = arith.constant 0 : i32
    %c0_i32_1 = arith.constant 0 : i32
    %c0_i32_2 = arith.constant 0 : i32
    return %c0_i32, %c0_i32_0, %c0_i32_1 : i32, i32, i32
  }
  func.func @transform_5(%arg0: i32) -> (i32, i32, i32) {
    %c0_i32 = arith.constant 0 : i32
    %c0_i32_0 = arith.constant 0 : i32
    %c0_i32_1 = arith.constant 0 : i32
    %c0_i32_2 = arith.constant 0 : i32
    return %c0_i32, %c0_i32_0, %c0_i32_1 : i32, i32, i32
  }
  func.func @transform_6(%arg0: i32) -> (i32, i32, i32) {
    %c0_i32 = arith.constant 0 : i32
    %c0_i32_0 = arith.constant 0 : i32
    %c0_i32_1 = arith.constant 0 : i32
    %c0_i32_2 = arith.constant 0 : i32
    return %c0_i32, %c0_i32_0, %c0_i32_1 : i32, i32, i32
  }
  func.func @transform_7(%arg0: i32) -> (i32, i32, i32) {
    %c0_i32 = arith.constant 0 : i32
    %c0_i32_0 = arith.constant 0 : i32
    %c0_i32_1 = arith.constant 0 : i32
    %c0_i32_2 = arith.constant 0 : i32
    return %c0_i32, %c0_i32_0, %c0_i32_1 : i32, i32, i32
  }
  func.func @transform_8(%arg0: i32) -> (i32, i32) {
    %c0_i32 = arith.constant 0 : i32
    %c0_i32_0 = arith.constant 0 : i32
    %c0_i32_1 = arith.constant 0 : i32
    return %c0_i32, %c0_i32_0 : i32, i32
  }
  func.func @transform_9(%arg0: i32) -> (i32, i32) {
    %c0_i32 = arith.constant 0 : i32
    %c0_i32_0 = arith.constant 0 : i32
    %c0_i32_1 = arith.constant 0 : i32
    return %c0_i32, %c0_i32_0 : i32, i32
  }
  func.func @transform_10(%arg0: i32) -> (i32, i32) {
    %c0_i32 = arith.constant 0 : i32
    %c0_i32_0 = arith.constant 0 : i32
    %c0_i32_1 = arith.constant 0 : i32
    return %c0_i32, %c0_i32_0 : i32, i32
  }
  func.func @transform_11(%arg0: i32) -> (i32, i32) {
    %c0_i32 = arith.constant 0 : i32
    %c0_i32_0 = arith.constant 0 : i32
    %c0_i32_1 = arith.constant 0 : i32
    return %c0_i32, %c0_i32_0 : i32, i32
  }
  func.func @transform_12(%arg0: i32) -> (i32, i32) {
    %c0_i32 = arith.constant 0 : i32
    %c0_i32_0 = arith.constant 0 : i32
    %c0_i32_1 = arith.constant 0 : i32
    return %c0_i32, %c0_i32_0 : i32, i32
  }
  func.func @transform_13(%arg0: i32) -> (i32, i32, i32) {
    %c0_i32 = arith.constant 0 : i32
    %c0_i32_0 = arith.constant 0 : i32
    %c0_i32_1 = arith.constant 0 : i32
    return %arg0, %c0_i32, %c0_i32_0 : i32, i32, i32
  }
}

</mosaic_0001>

<bundles_post_ra>
// kernel: tpu_custom_call.1
= control target key start
LH: loop header
LB: loop body
LE: loop exit
PB: predicated region body
PF: predicated region fallthrough
CT: control target
= control target key end

     0   :  { %vm125_vm0 = vcmask 261120   ;;  %s6001_s0 = inlined_call_operand.vmem [shape: f32[2,8,32], index: 0, kind: input, shape index: {}]   ;;  %s6002_s1 = inlined_call_operand.vmem [shape: f32[4,32,8], index: 1, kind: input, shape index: {}]   ;;  %s6003_s2 = inlined_call_operand.vmem [shape: f32[4,32,8], index: 2, kind: input, shape index: {}]   ;;  %s6004_s3 = inlined_call_operand.vmem [shape: f32[4,32,8], index: 3, kind: input, shape index: {}]   ;;  %s6005_s4 = inlined_call_operand.vmem [shape: f32[4,1,8], index: 4, kind: input, shape index: {}]   ;;  %s6006_s5 = inlined_call_operand.vmem [shape: f32[4,1,8], index: 5, kind: input, shape index: {}]   ;;  %s6007_s6 = inlined_call_operand.vmem [shape: f32[4,1,8], index: 6, kind: input, shape index: {}]   ;;  %s6008_s7 = inlined_call_operand.vmem [shape: f32[4,8,32], index: 7, kind: input, shape index: {}]   ;;  %s6009_s8 = inlined_call_operand.vmem [shape: f32[1,32], index: 8, kind: input, shape index: {}]   ;;  %s6010_s9 = inlined_call_operand.vmem [shape: f32[32,64], index: 9, kind: input, shape index: {}]   ;;  %s6011_s10 = inlined_call_operand.vmem [shape: f32[1,64], index: 10, kind: input, shape index: {}]   ;;  %s6012_s11 = inlined_call_operand.vmem [shape: f32[64,32], index: 11, kind: input, shape index: {}]   ;;  %s6013_s12 = inlined_call_operand.vmem [shape: f32[1,32], index: 12, kind: input, shape index: {}]   ;;  %s6014_s13 = inlined_call_operand.hbm [shape: f32[2,8,32], index: 13, kind: output, shape index: {}]  }
   0x1   :  { %v5213_v0 = vld [vmem:[%s6001_s0] sm:$0xff] }
   0x2   :  { %18 = vsyncpa [#allocation3], 0  ;;  %v126_v1 = vsel %vm125_vm0, %v5213_v0, 0.0  ;;  %v45_v7 = vld [vmem:[%s6002_s1] sm:$0xff]  ;;  %v46_v8 = vld [vmem:[%s6002_s1 + $0x8] sm:$0xff]  ;;  %v5134_v12 = vmov 0.0|0.0  }
   0x3   :  { %127 = vadd.xlane.f32.xlu0 %v126_v1  ;;  %v49_v9 = vld [vmem:[%s6002_s1 + $0x20] sm:$0xff]  ;;  %v5228_v10 = vpack.c.bf16 %v46_v8, %v45_v7  ;;  %v50_v11 = vld [vmem:[%s6002_s1 + $0x28] sm:$0xff]  ;;  %4880 = vmatprep.subr.bf16.mxu0 %v5134_v12  ;;  %v47_v14 = vld [vmem:[%s6002_s1 + $0x10] sm:$0xff]  ;;  %vm5135_vm1 = vmmov 0   ;;  %v5136_v20 = vmov 0.0   ;;  %vm1055_vm2 = vcmask 64512  }
   0x4   :  { %4886 = vmatprep.subr.bf16.mxu1 %v5134_v12  ;;  %v5235_v13 = vpack.c.bf16 %v50_v11, %v49_v9  ;;  %v48_v15 = vld [vmem:[%s6002_s1 + $0x18] sm:$0xff]  ;;  %v51_v16 = vld [vmem:[%s6002_s1 + $0x30] sm:$0xff]  ;;  %4444 = vmatprep.mubr.msk.f32.mxu0 %vm5135_vm1, %v5136_v20  ;;  %v53_v24 = vld [vmem:[%s6002_s1 + $0x40] sm:$0xff]  ;;  %vm2106_vm3 = vcmask 523264  }
   0x5   :  { %4882 = vmatpush3.bf16.msra.mxu0 %v5228_v10  ;;  %v5250_v17 = vpack.c.bf16 %v48_v15, %v47_v14  ;;  %v52_v18 = vld [vmem:[%s6002_s1 + $0x38] sm:$0xff]  ;;  %4455 = vmatprep.mubr.msk.f32.mxu1 %vm5135_vm1, %v5136_v20  ;;  %v54_v25 = vld [vmem:[%s6002_s1 + $0x48] sm:$0xff]  ;;  %v57_v26 = vld [vmem:[%s6002_s1 + $0x60] sm:$0xff] }
   0x6   :  { %4888 = vmatpush3.bf16.msra.mxu1 %v5235_v13  ;;  %4883 = vmatprep.subr.bf16.mxu0 %v5134_v12  ;;  %v5255_v19 = vpack.c.bf16 %v52_v18, %v51_v16  ;;  %v58_v27 = vld [vmem:[%s6002_s1 + $0x68] sm:$0xff]  ;;  %v5277_v29 = vpack.c.bf16 %v54_v25, %v53_v24  ;;  %v55_v31 = vld [vmem:[%s6002_s1 + $0x50] sm:$0xff]  ;;  %v56_v33 = vld [vmem:[%s6002_s1 + $0x58] sm:$0xff] }
   0x7   :  { %4889 = vmatprep.subr.bf16.mxu1 %v5134_v12  ;;  %v5279_v30 = vpack.c.bf16 %v58_v27, %v57_v26  ;;  %v59_v34 = vld [vmem:[%s6002_s1 + $0x70] sm:$0xff]  ;;  %v60_v35 = vld [vmem:[%s6002_s1 + $0x78] sm:$0xff]  ;;  %v5301_v36 = vpack.c.bf16 %v56_v33, %v55_v31  ;;  %v61_v38 = vld [vmem:[%s6003_s2] sm:$0xff] }
   0x8   :  { %v5303_v37 = vpack.c.bf16 %v60_v35, %v59_v34  ;;  %v62_v39 = vld [vmem:[%s6003_s2 + $0x8] sm:$0xff]  ;;  %v65_v40 = vld [vmem:[%s6003_s2 + $0x20] sm:$0xff]  ;;  %v63_v44 = vld [vmem:[%s6003_s2 + $0x10] sm:$0xff] }
   0x9   :  { %4885 = vmatpush3.bf16.msra.mxu0 %v5250_v17  ;;  %v66_v41 = vld [vmem:[%s6003_s2 + $0x28] sm:$0xff]  ;;  %v5325_v42 = vpack.c.bf16 %v62_v39, %v61_v38  ;;  %v64_v45 = vld [vmem:[%s6003_s2 + $0x18] sm:$0xff]  ;;  %v67_v46 = vld [vmem:[%s6003_s2 + $0x30] sm:$0xff] }
   0xa   :  { %4891 = vmatpush3.bf16.msra.mxu1 %v5255_v19  ;;  %4892 = vmatprep.subr.bf16.mxu0 %v5134_v12  ;;  %v5327_v43 = vpack.c.bf16 %v66_v41, %v65_v40  ;;  %v68_v47 = vld [vmem:[%s6003_s2 + $0x38] sm:$0xff]  ;;  %v5349_v48 = vpack.c.bf16 %v64_v45, %v63_v44  ;;  %v69_v50 = vld [vmem:[%s6003_s2 + $0x40] sm:$0xff]  ;;  %v70_v51 = vld [vmem:[%s6003_s2 + $0x48] sm:$0xff] }
   0xb   :  { %4898 = vmatprep.subr.bf16.mxu1 %v5134_v12  ;;  %v5351_v49 = vpack.c.bf16 %v68_v47, %v67_v46  ;;  %v73_v52 = vld [vmem:[%s6003_s2 + $0x60] sm:$0xff]  ;;  %v74_v53 = vld [vmem:[%s6003_s2 + $0x68] sm:$0xff]  ;;  %v5373_v54 = vpack.c.bf16 %v70_v51, %v69_v50  ;;  %v71_v56 = vld [vmem:[%s6003_s2 + $0x50] sm:$0xff] }
   0xc   :  { %v5375_v55 = vpack.c.bf16 %v74_v53, %v73_v52  ;;  %v72_v57 = vld [vmem:[%s6003_s2 + $0x58] sm:$0xff]  ;;  %v75_v58 = vld [vmem:[%s6003_s2 + $0x70] sm:$0xff]  ;;  %v77_v62 = vld [vmem:[%s6004_s3] sm:$0xff] }
   0xd   :  { %v76_v59 = vld [vmem:[%s6003_s2 + $0x78] sm:$0xff]  ;;  %v5397_v60 = vpack.c.bf16 %v72_v57, %v71_v56  ;;  %v78_v63 = vld [vmem:[%s6004_s3 + $0x8] sm:$0xff]  ;;  %v81_v1 = vld [vmem:[%s6004_s3 + $0x20] sm:$0xff] }
   0xe   :  { %v5399_v61 = vpack.c.bf16 %v76_v59, %v75_v58  ;;  %v83_v7 = vld [vmem:[%s6004_s3 + $0x30] sm:$0xff]  ;;  %v84_v8 = vld [vmem:[%s6004_s3 + $0x38] sm:$0xff]  ;;  %v85_v14 = vld [vmem:[%s6004_s3 + $0x40] sm:$0xff] }
   0xf   :  { %v5447_v11 = vpack.c.bf16 %v84_v8, %v83_v7  ;;  %v86_v15 = vld [vmem:[%s6004_s3 + $0x48] sm:$0xff]  ;;  %v89_v16 = vld [vmem:[%s6004_s3 + $0x60] sm:$0xff]  ;;  %v88_v24 = vld [vmem:[%s6004_s3 + $0x58] sm:$0xff] }
  0x10   :  { %v90_v18 = vld [vmem:[%s6004_s3 + $0x68] sm:$0xff]  ;;  %v91_v25 = vld [vmem:[%s6004_s3 + $0x70] sm:$0xff]  ;;  %v92_v26 = vld [vmem:[%s6004_s3 + $0x78] sm:$0xff] }
  0x11   :  { %v5518_v44 = vld [vmem:[%s6006_s5] ss:$0 sm:$0xff]  ;;  %v5529_v52 = vld [vmem:[%s6006_s5 + $0x1] ss:$0 sm:$0xff]  ;;  %v5544_v58 = vld [vmem:[%s6006_s5 + $0x2] ss:$0 sm:$0xff] }
  0x12   :  { %v5523_v46 = vld [vmem:[%s6005_s4] ss:$0 sm:$0xff]  ;;  %v5537_v56 = vld [vmem:[%s6005_s4 + $0x1] ss:$0 sm:$0xff]  ;;  %v5549_v59 = vld [vmem:[%s6006_s5 + $0x3] ss:$0 sm:$0xff] }
  0x90   :  { %v128_v2 = vpop.xlane.xlu0 %127 }
  0x91   :  { %v130_v3 = vmul.f32 0.03125, %v128_v2  ;;  %v82_v2 = vld [vmem:[%s6004_s3 + $0x28] sm:$0xff] }
  0x93   :  { %v131_v4 = vsub.f32 %v5213_v0, %v130_v3  ;;  %v5421_v3 = vpack.c.bf16 %v78_v63, %v77_v62 }
  0x95   :  { %v132_v5 = vmul.f32 %v131_v4, %v131_v4 }
  0x97   :  { %v133_v6 = vsel %vm125_vm0, %v132_v5, 0.0  ;;  %v79_v5 = vld [vmem:[%s6004_s3 + $0x10] sm:$0xff] }
  0x98   :  { %134 = vadd.xlane.f32.xlu0 %v133_v6  ;;  %v80_v6 = vld [vmem:[%s6004_s3 + $0x18] sm:$0xff] }
  0x99   :  { %v5445_v9 = vpack.c.bf16 %v80_v6, %v79_v5  ;;  %v5564_v5 = vld [vmem:[%s6005_s4 + $0x3] ss:$0 sm:$0xff] }
 0x125   :  { %v135_v21 = vpop.xlane.xlu0 %134 }
 0x126   :  { %v136_v22 = vmul.f32 0.03125, %v135_v21  ;;  %v5469_v21 = vpack.c.bf16 %v86_v15, %v85_v14 }
 0x128   :  { %v137_v23 = vadd.f32 1e-05, %v136_v22  ;;  %v5471_v22 = vpack.c.bf16 %v90_v18, %v89_v16  ;;  %v5582_v18 = vld [vmem:[%s6007_s6] ss:$0 sm:$0xff] }
 0x12a   :  { %5066 = vrsqrt.f32 %v137_v23  ;;  %v87_v23 = vld [vmem:[%s6004_s3 + $0x50] sm:$0xff] }
 0x12b   :  { %v5493_v27 = vpack.c.bf16 %v88_v24, %v87_v23  ;;  %v5587_v23 = vld [vmem:[%s6007_s6 + $0x1] ss:$0 sm:$0xff] }
 0x134   :  { %v5067_v28 = vpop.eup %5066 }
 0x135   :  { %v5284_v32 = vmul.f32 %v5067_v28, %v131_v4  ;;  %v5423_v4 = vpack.c.bf16 %v82_v2, %v81_v1  ;;  %v5495_v28 = vpack.c.bf16 %v92_v26, %v91_v25  ;;  %v5559_v2 = vld [vmem:[%s6005_s4 + $0x2] ss:$0 sm:$0xff] }
 0x137   :  { %4445 = vmatmul.mubr.msk.f32.vlgmr.msra.gmra.mrb[0].mxu0 %vm125_vm0, %v5284_v32  ;;  %4456 = vmatmul.mubr.msk.f32.vlgmr.msra.gmra.mrb[0].mxu1 %vm125_vm0, %v5284_v32 }
 0x138   :  { %4894 = vmatpush3.bf16.msra.mxu0 %v5277_v29  ;;  %4900 = vmatpush3.bf16.msra.mxu1 %v5279_v30 }
 0x139   :  { %4895 = vmatprep.subr.bf16.mxu0 %v5134_v12  ;;  %4901 = vmatprep.subr.bf16.mxu1 %v5134_v12 }
 0x13a   :  { %4466 = vmatprep.mubr.msk.f32.mxu0 %vm5135_vm1, %v5136_v20  ;;  %4477 = vmatprep.mubr.msk.f32.mxu1 %vm5135_vm1, %v5136_v20 }
 0x13c   :  { %4897 = vmatpush3.bf16.msra.mxu0 %v5301_v36  ;;  %4903 = vmatpush3.bf16.msra.mxu1 %v5303_v37 }
 0x13d   :  { %4904 = vmatprep.subr.bf16.mxu0 %v5134_v12  ;;  %4910 = vmatprep.subr.bf16.mxu1 %v5134_v12 }
 0x13f   :  { %4467 = vmatmul.mubr.msk.f32.vlgmr.msra.gmra.mrb[2].mxu0 %vm125_vm0, %v5284_v32  ;;  %4478 = vmatmul.mubr.msk.f32.vlgmr.msra.gmra.mrb[2].mxu1 %vm125_vm0, %v5284_v32 }
 0x140   :  { %4906 = vmatpush3.bf16.msra.mxu0 %v5325_v42  ;;  %4912 = vmatpush3.bf16.msra.mxu1 %v5327_v43 }
 0x141   :  { %4907 = vmatprep.subr.bf16.mxu0 %v5134_v12  ;;  %4913 = vmatprep.subr.bf16.mxu1 %v5134_v12 }
 0x142   :  { %4488 = vmatprep.mubr.msk.f32.mxu0 %vm5135_vm1, %v5136_v20  ;;  %4499 = vmatprep.mubr.msk.f32.mxu1 %vm5135_vm1, %v5136_v20 }
 0x144   :  { %4909 = vmatpush3.bf16.msra.mxu0 %v5349_v48  ;;  %4915 = vmatpush3.bf16.msra.mxu1 %v5351_v49 }
 0x145   :  { %4916 = vmatprep.subr.bf16.mxu0 %v5134_v12  ;;  %4922 = vmatprep.subr.bf16.mxu1 %v5134_v12 }
 0x147   :  { %4489 = vmatmul.mubr.msk.f32.vlgmr.msra.gmra.mrb[4].mxu0 %vm125_vm0, %v5284_v32  ;;  %4500 = vmatmul.mubr.msk.f32.vlgmr.msra.gmra.mrb[4].mxu1 %vm125_vm0, %v5284_v32 }
 0x148   :  { %4918 = vmatpush3.bf16.msra.mxu0 %v5373_v54  ;;  %4924 = vmatpush3.bf16.msra.mxu1 %v5375_v55 }
 0x149   :  { %4919 = vmatprep.subr.bf16.mxu0 %v5134_v12  ;;  %4925 = vmatprep.subr.bf16.mxu1 %v5134_v12 }
 0x14a   :  { %4510 = vmatprep.mubr.msk.f32.mxu0 %vm5135_vm1, %v5136_v20  ;;  %4521 = vmatprep.mubr.msk.f32.mxu1 %vm5135_vm1, %v5136_v20 }
 0x14c   :  { %4921 = vmatpush3.bf16.msra.mxu0 %v5397_v60  ;;  %4927 = vmatpush3.bf16.msra.mxu1 %v5399_v61 }
 0x14d   :  { %4928 = vmatprep.subr.bf16.mxu0 %v5134_v12  ;;  %4934 = vmatprep.subr.bf16.mxu1 %v5134_v12 }
 0x14f   :  { %4511 = vmatmul.mubr.msk.f32.vlgmr.msra.gmra.mrb[6].mxu0 %vm125_vm0, %v5284_v32  ;;  %4522 = vmatmul.mubr.msk.f32.vlgmr.msra.gmra.mrb[6].mxu1 %vm125_vm0, %v5284_v32 }
 0x150   :  { %4930 = vmatpush3.bf16.msra.mxu0 %v5421_v3  ;;  %4936 = vmatpush3.bf16.msra.mxu1 %v5423_v4 }
 0x151   :  { %4931 = vmatprep.subr.bf16.mxu0 %v5134_v12  ;;  %4937 = vmatprep.subr.bf16.mxu1 %v5134_v12 }
 0x152   :  { %4532 = vmatprep.mubr.msk.f32.mxu0 %vm5135_vm1, %v5136_v20  ;;  %4543 = vmatprep.mubr.msk.f32.mxu1 %vm5135_vm1, %v5136_v20 }
 0x154   :  { %4933 = vmatpush3.bf16.msra.mxu0 %v5445_v9  ;;  %4939 = vmatpush3.bf16.msra.mxu1 %v5447_v11 }
 0x155   :  { %4940 = vmatprep.subr.bf16.mxu0 %v5134_v12  ;;  %4946 = vmatprep.subr.bf16.mxu1 %v5134_v12 }
 0x157   :  { %4533 = vmatmul.mubr.msk.f32.vlgmr.msra.gmra.mrb[8].mxu0 %vm125_vm0, %v5284_v32  ;;  %4544 = vmatmul.mubr.msk.f32.vlgmr.msra.gmra.mrb[8].mxu1 %vm125_vm0, %v5284_v32 }
 0x158   :  { %4942 = vmatpush3.bf16.msra.mxu0 %v5469_v21  ;;  %4948 = vmatpush3.bf16.msra.mxu1 %v5471_v22 }
 0x159   :  { %4943 = vmatprep.subr.bf16.mxu0 %v5134_v12  ;;  %4949 = vmatprep.subr.bf16.mxu1 %v5134_v12 }
 0x15a   :  { %4554 = vmatprep.mubr.msk.f32.mxu0 %vm5135_vm1, %v5136_v20  ;;  %4565 = vmatprep.mubr.msk.f32.mxu1 %vm5135_vm1, %v5136_v20 }
 0x15c   :  { %4945 = vmatpush3.bf16.msra.mxu0 %v5493_v27  ;;  %4951 = vmatpush3.bf16.msra.mxu1 %v5495_v28 }
 0x15d   :  { %4568 = vmatprep.subr.mxu0 %v5136_v20  ;;  %4583 = vmatprep.subr.mxu1 %v5136_v20 }
 0x15f   :  { %4555 = vmatmul.mubr.msk.f32.vlgmr.msra.gmra.mrb[10].mxu0 %vm125_vm0, %v5284_v32  ;;  %4566 = vmatmul.mubr.msk.f32.vlgmr.msra.gmra.mrb[10].mxu1 %vm125_vm0, %v5284_v32 }
 0x160   :  { %4570 = vmatprep.mubr.msk.f32.mxu0 %vm5135_vm1, %v5136_v20  ;;  %4585 = vmatprep.mubr.msk.f32.mxu1 %vm5135_vm1, %v5136_v20 }
 0x20a   :  { %v233_v31 = vpop.f32.mrb[0].mxu0  ;;  %v303_v33 = vpop.f32.mrb[0].mxu1 }
 0x20b   :  { %v4446_v34 = vpop.f32.mrb[1].mxu0  ;;  %v4457_v35 = vpop.f32.mrb[1].mxu1  ;;  %v234_v53 = vadd.f32 %v5523_v46, %v233_v31  ;;  %v304_v62 = vadd.f32 %v5537_v56, %v303_v33 }
 0x212   :  { %v373_v38 = vpop.f32.mrb[2].mxu0  ;;  %v443_v39 = vpop.f32.mrb[2].mxu1 }
 0x213   :  { %v4468_v40 = vpop.f32.mrb[3].mxu0  ;;  %v4479_v41 = vpop.f32.mrb[3].mxu1  ;;  %v374_v15 = vadd.f32 %v5559_v2, %v373_v38  ;;  %v444_v16 = vadd.f32 %v5564_v5, %v443_v39 }
 0x21a   :  { %v537_v32 = vpop.f32.mrb[4].mxu0  ;;  %v607_v45 = vpop.f32.mrb[4].mxu1 }
 0x21b   :  { %v538_v47 = vadd.f32 %v5518_v44, %v537_v32  ;;  %v4490_v50 = vpop.f32.mrb[5].mxu0  ;;  %v4501_v51 = vpop.f32.mrb[5].mxu1  ;;  %v608_v57 = vadd.f32 %v5529_v52, %v607_v45 }
 0x21d   :  { %4569 = vmatpush3.xpose.msk.msra.mxu0 %vm1055_vm2, %v538_v47 }
 0x21e   :  { %4573 = vmatprep.subr.mxu0 %v5136_v20 }
 0x220   :  { %4571 = vmatmul.mubr.msk.f32.vlgmr.msra.gmra.mrb[12].mxu0 %vm1055_vm2, %v234_v53 }
 0x221   :  { %4574 = vmatpush3.xpose.msk.msra.mxu0 %vm1055_vm2, %v608_v57  ;;  %4575 = vmatprep.mubr.msk.f32.mxu0 %vm5135_vm1, %v5136_v20 }
 0x222   :  { %v677_v63 = vpop.f32.mrb[6].mxu0  ;;  %v747_v1 = vpop.f32.mrb[6].mxu1  ;;  %4578 = vmatprep.subr.mxu0 %v5136_v20 }
 0x223   :  { %v678_v6 = vadd.f32 %v5544_v58, %v677_v63  ;;  %v748_v7 = vadd.f32 %v5549_v59, %v747_v1  ;;  %v4512_v8 = vpop.f32.mrb[7].mxu0  ;;  %v4523_v14 = vpop.f32.mrb[7].mxu1 }
 0x224   :  { %4576 = vmatmul.mubr.msk.f32.vlgmr.msra.gmra.mrb[14].mxu0 %vm1055_vm2, %v304_v62 }
 0x225   :  { %4579 = vmatpush3.xpose.msk.msra.mxu0 %vm1055_vm2, %v678_v6  ;;  %4584 = vmatpush3.xpose.msk.msra.mxu1 %vm1055_vm2, %v748_v7 }
 0x226   :  { %4580 = vmatprep.mubr.msk.f32.mxu0 %vm5135_vm1, %v5136_v20  ;;  %4588 = vmatprep.subr.mxu0 %v5136_v20 }
 0x227   :  { %4593 = vmatprep.subr.mxu1 %v5136_v20 }
 0x228   :  { %4581 = vmatmul.mubr.msk.f32.vlgmr.msra.gmra.mrb[16].mxu0 %vm1055_vm2, %v374_v15  ;;  %4586 = vmatmul.mubr.msk.f32.vlgmr.msra.gmra.mrb[12].mxu1 %vm1055_vm2, %v444_v16 }
 0x229   :  { %4590 = vmatprep.mubr.msk.f32.mxu0 %vm5135_vm1, %v5136_v20  ;;  %4595 = vmatprep.mubr.msk.f32.mxu1 %vm5135_vm1, %v5136_v20 }
 0x22a   :  { %v841_v24 = vpop.f32.mrb[8].mxu0  ;;  %v911_v25 = vpop.f32.mrb[8].mxu1 }
 0x22b   :  { %v842_v26 = vadd.f32 %v5582_v18, %v841_v24  ;;  %v912_v31 = vadd.f32 %v5587_v23, %v911_v25  ;;  %v4534_v33 = vpop.f32.mrb[9].mxu0  ;;  %v4545_v34 = vpop.f32.mrb[9].mxu1 }
 0x22d   :  { %4589 = vmatpush3.msra.mxu0 %v842_v26  ;;  %4594 = vmatpush3.msra.mxu1 %v912_v31 }
 0x22e   :  { %4598 = vmatprep.subr.mxu0 %v5136_v20  ;;  %4603 = vmatprep.subr.mxu1 %v5136_v20 }
 0x232   :  { %v981_v35 = vpop.f32.mrb[10].mxu0  ;;  %v5597_v38 = vpop.f32.mrb[10].mxu1 }
 0x233   :  { %v4556_v39 = vpop.f32.mrb[11].mxu0  ;;  %v4567_v40 = vpop.f32.mrb[11].mxu1 }
 0x2f3   :  { %v1128_v41 = vpop.f32.mrb[12].mxu0 }
 0x2f4   :  { %v4572_v32 = vpop.f32.mrb[13].mxu0  ;;  %v1360_v45 = vsel %vm1055_vm2, %v1128_v41, -inf }
 0x2f5   :  { %1361 = vmax.xlane.f32.xlu1 %v1360_v45 }
 0x2f7   :  { %v1204_v47 = vpop.f32.mrb[14].mxu0 }
 0x2f8   :  { %v4577_v50 = vpop.f32.mrb[15].mxu0  ;;  %v1363_v51 = vsel %vm1055_vm2, %v1204_v47, -inf }
 0x2f9   :  { %1364 = vmax.xlane.f32.xlu1 %v1363_v51 }
 0x2fb   :  { %v1280_v53 = vpop.f32.mrb[16].mxu0  ;;  %v1356_v57 = vpop.f32.mrb[12].mxu1 }
 0x2fc   :  { %v4582_v62 = vpop.f32.mrb[17].mxu0  ;;  %v4587_v63 = vpop.f32.mrb[13].mxu1  ;;  %v1369_v1 = vsel %vm1055_vm2, %v1356_v57, -inf  ;;  %v1366_v6 = vsel %vm1055_vm2, %v1280_v53, -inf }
 0x2fd   :  { %1370 = vmax.xlane.f32.xlu1 %v1369_v1  ;;  %1367 = vmax.xlane.f32.xlu0 %v1366_v6  ;;  %v5610_v6 = vld [vmem:[%s6007_s6 + $0x2] ss:$0 sm:$0xff] }
 0x382   :  { %v1362_v7 = vpop.xlane.xlu1 %1361 }
 0x383   :  { %v1372_v8 = vsub.f32 %v1128_v41, %v1362_v7 }
 0x385   :  { %v1376_v14 = vmul.f32 1.442695, %v1372_v8 }
 0x386   :  { %v1365_v15 = vpop.xlane.xlu1 %1364 }
 0x387   :  { %5068 = vpow2.f32 %v1376_v14  ;;  %v1373_v16 = vsub.f32 %v1204_v47, %v1365_v15  ;;  %v982_v14 = vadd.f32 %v5610_v6, %v981_v35  ;;  %v5616_v15 = vld [vmem:[%s6007_s6 + $0x3] ss:$0 sm:$0xff] }
 0x389   :  { %v1378_v24 = vmul.f32 1.442695, %v1373_v16 }
 0x38a   :  { %v1371_v25 = vpop.xlane.xlu1 %1370  ;;  %v1368_v26 = vpop.xlane.xlu0 %1367 }
 0x38b   :  { %5070 = vpow2.f32 %v1378_v24  ;;  %v1375_v31 = vsub.f32 %v1356_v57, %v1371_v25  ;;  %v1374_v33 = vsub.f32 %v1280_v53, %v1368_v26  ;;  %v1052_v25 = vadd.f32 %v5616_v15, %v5597_v38  ;;  %v5637_v38 = vld [vmem:[%s6008_s7] sm:$0xff] }
 0x38d   :  { %v1382_v34 = vmul.f32 1.442695, %v1375_v31  ;;  %v1380_v39 = vmul.f32 1.442695, %v1374_v33 }
 0x38f   :  { %5072 = vpow2.f32 %v1382_v34  ;;  %v5644_v34 = vld [vmem:[%s6008_s7 + $0x8] sm:$0xff] }
 0x390   :  { %5074 = vpow2.f32 %v1380_v39  ;;  %v5651_v39 = vld [vmem:[%s6008_s7 + $0x10] sm:$0xff] }
 0x391   :  { %v5069_v40 = vpop.eup %5068 }
 0x392   :  { %v1384_v32 = vsel %vm1055_vm2, %v5069_v40, 0.0 }
 0x393   :  { %1385 = vadd.xlane.f32.xlu0 %v1384_v32 }
 0x395   :  { %v5071_v45 = vpop.eup %5070 }
 0x396   :  { %v1387_v41 = vsel %vm1055_vm2, %v5071_v45, 0.0 }
 0x397   :  { %1388 = vadd.xlane.f32.xlu1 %v1387_v41 }
 0x399   :  { %v5073_v50 = vpop.eup %5072 }
 0x39a   :  { %v5075_v47 = vpop.eup %5074  ;;  %v1393_v51 = vsel %vm1055_vm2, %v5073_v50, 0.0 }
 0x39b   :  { %1394 = vadd.xlane.f32.xlu1 %v1393_v51  ;;  %v1390_v57 = vsel %vm1055_vm2, %v5075_v47, 0.0 }
 0x39c   :  { %1391 = vadd.xlane.f32.xlu0 %v1390_v57 }
 0x420   :  { %v1386_v53 = vpop.xlane.xlu0 %1385 }
 0x421   :  { %5076 = vrcp.f32 %v1386_v53 }
 0x424   :  { %v1389_v62 = vpop.xlane.xlu1 %1388 }
 0x425   :  { %5078 = vrcp.f32 %v1389_v62 }
 0x428   :  { %v1395_v63 = vpop.xlane.xlu1 %1394 }
 0x429   :  { %5080 = vrcp.f32 %v1395_v63  ;;  %v1392_v1 = vpop.xlane.xlu0 %1391 }
 0x42a   :  { %5082 = vrcp.f32 %v1392_v1 }
 0x42b   :  { %v5077_v7 = vpop.eup %5076 }
 0x42c   :  { %v1400_v8 = vmul.f32 %v5077_v7, %v5069_v40 }
 0x42e   :  { %4591 = vmatmul.mubr.msk.f32.vlgmr.msra.gmra.mrb[18].mxu0 %vm1055_vm2, %v1400_v8 }
 0x42f   :  { %v5079_v16 = vpop.eup %5078  ;;  %4599 = vmatpush3.msra.mxu0 %v982_v14  ;;  %4600 = vmatprep.mubr.msk.f32.mxu0 %vm5135_vm1, %v5136_v20 }
 0x430   :  { %v1401_v24 = vmul.f32 %v5079_v16, %v5071_v45  ;;  %4608 = vmatprep.subr.mxu0 %v5136_v20  ;;  %v5660_v45 = vld [vmem:[%s6008_s7 + $0x18] sm:$0xff] }
 0x432   :  { %4596 = vmatmul.mubr.msk.f32.vlgmr.msra.gmra.mrb[14].mxu1 %vm1055_vm2, %v1401_v24 }
 0x433   :  { %v5081_v35 = vpop.eup %5080  ;;  %4604 = vmatpush3.msra.mxu1 %v1052_v25  ;;  %4605 = vmatprep.mubr.msk.f32.mxu1 %vm5135_vm1, %v5136_v20 }
 0x434   :  { %v5083_v26 = vpop.eup %5082  ;;  %v1403_v31 = vmul.f32 %v5081_v35, %v5073_v50  ;;  %4613 = vmatprep.subr.mxu1 %v5136_v20 }
 0x435   :  { %v1402_v33 = vmul.f32 %v5083_v26, %v5075_v47 }
 0x436   :  { %4606 = vmatmul.mubr.msk.f32.vlgmr.msra.gmra.mrb[16].mxu1 %vm1055_vm2, %v1403_v31 }
 0x437   :  { %4601 = vmatmul.mubr.msk.f32.vlgmr.msra.gmra.mrb[20].mxu0 %vm1055_vm2, %v1402_v33  ;;  %4615 = vmatprep.mubr.msk.f32.mxu1 %vm5135_vm1, %v5136_v20 }
 0x438   :  { %4610 = vmatprep.mubr.msk.f32.mxu0 %vm5135_vm1, %v5136_v20  ;;  %4609 = vmatpush3.msra.mxu0 %v5637_v38 }
 0x439   :  { %4618 = vmatprep.subr.mxu0 %v5136_v20  ;;  %4614 = vmatpush3.msra.mxu1 %v5644_v34 }
 0x43a   :  { %4623 = vmatprep.subr.mxu1 %v5136_v20 }
 0x501   :  { %v1473_v40 = vpop.f32.mrb[18].mxu0 }
 0x502   :  { %v4592_v32 = vpop.f32.mrb[19].mxu0  ;;  %4611 = vmatmul.mubr.msk.f32.vlgmr.msra.gmra.mrb[22].mxu0 %vm1055_vm2, %v1473_v40  ;;  %v5680_v40 = vld [vmem:[%s6009_s8] ss:$0 sm:$0xff] }
 0x503   :  { %4619 = vmatpush3.msra.mxu0 %v5651_v39  ;;  %4620 = vmatprep.mubr.msk.f32.mxu0 %vm5135_vm1, %v5136_v20 }
 0x504   :  { %4952 = vmatprep.subr.bf16.mxu0 %v5134_v12 }
 0x505   :  { %v1546_v41 = vpop.f32.mrb[14].mxu1 }
 0x506   :  { %v4597_v50 = vpop.f32.mrb[15].mxu1  ;;  %4616 = vmatmul.mubr.msk.f32.vlgmr.msra.gmra.mrb[18].mxu1 %vm1055_vm2, %v1546_v41 }
 0x507   :  { %4624 = vmatpush3.msra.mxu1 %v5660_v45  ;;  %4625 = vmatprep.mubr.msk.f32.mxu1 %vm5135_vm1, %v5136_v20 }
 0x508   :  { %4958 = vmatprep.subr.bf16.mxu1 %v5134_v12 }
 0x509   :  { %v1692_v47 = vpop.f32.mrb[16].mxu1 }
 0x50a   :  { %v1619_v51 = vpop.f32.mrb[20].mxu0  ;;  %v4607_v57 = vpop.f32.mrb[17].mxu1  ;;  %4626 = vmatmul.mubr.msk.f32.vlgmr.msra.gmra.mrb[20].mxu1 %vm1055_vm2, %v1692_v47 }
 0x50b   :  { %v4602_v53 = vpop.f32.mrb[21].mxu0  ;;  %4621 = vmatmul.mubr.msk.f32.vlgmr.msra.gmra.mrb[24].mxu0 %vm1055_vm2, %v1619_v51  ;;  %4655 = vmatprep.mubr.msk.f32.mxu1 %vm5135_vm1, %v5136_v20  ;;  %v5690_v51 = vld [vmem:[%s6001_s0 + $0x8] sm:$0xff] }
 0x50c   :  { %4636 = vmatprep.mubr.msk.f32.mxu0 %vm5135_vm1, %v5136_v20  ;;  %v2184_v53 = vsel %vm125_vm0, %v5690_v51, 0.0 }
 0x5d5   :  { %v1765_v62 = vpop.f32.mrb[22].mxu0 }
 0x5d6   :  { %v4612_v63 = vpop.f32.mrb[23].mxu0  ;;  %v1988_v7 = vsel %vm125_vm0, %v1765_v62, 0.0 }
 0x5d9   :  { %v1838_v1 = vpop.f32.mrb[18].mxu1 }
 0x5da   :  { %v1989_v8 = vsel %vm125_vm0, %v1838_v1, 0.0  ;;  %v4617_v14 = vpop.f32.mrb[19].mxu1 }
 0x5db   :  { %v1990_v16 = vadd.f32 %v1989_v8, %v1988_v7 }
 0x5dd   :  { %v1984_v24 = vpop.f32.mrb[20].mxu1 }
 0x5de   :  { %v1911_v25 = vpop.f32.mrb[24].mxu0  ;;  %v4627_v35 = vpop.f32.mrb[21].mxu1  ;;  %v1993_v32 = vsel %vm125_vm0, %v1984_v24, 0.0 }
 0x5df   :  { %v1991_v26 = vsel %vm125_vm0, %v1911_v25, 0.0  ;;  %v4622_v31 = vpop.f32.mrb[25].mxu0  ;;  %v110_v35 = vld [vmem:[%s6010_s9] sm:$0xff] }
 0x5e0   :  { %v1992_v33 = vadd.f32 %v1991_v26, %v1990_v16  ;;  %v111_v26 = vld [vmem:[%s6010_s9 + $0x8] sm:$0xff]  ;;  %v112_v31 = vld [vmem:[%s6010_s9 + $0x10] sm:$0xff] }
 0x5e2   :  { %v1994_v41 = vadd.f32 %v1993_v32, %v1992_v33  ;;  %v5709_v33 = vpack.c.bf16 %v111_v26, %v110_v35  ;;  %v113_v32 = vld [vmem:[%s6010_s9 + $0x18] sm:$0xff] }
 0x5e4   :  { %v2001_v50 = vadd.f32 %v5680_v40, %v1994_v41  ;;  %4954 = vmatpush3.bf16.msra.mxu0 %v5709_v33  ;;  %v5715_v41 = vpack.c.bf16 %v113_v32, %v112_v31 }
 0x5e5   :  { %4955 = vmatprep.subr.bf16.mxu0 %v5134_v12 }
 0x5e6   :  { %v5685_v47 = vadd.f32 %v2001_v50, %v5213_v0 }
 0x5e8   :  { %v2003_v57 = vsel %vm125_vm0, %v5685_v47, 0.0  ;;  %4957 = vmatpush3.bf16.msra.mxu0 %v5715_v41 }
 0x5e9   :  { %2004 = vadd.xlane.f32.xlu0 %v2003_v57  ;;  %4970 = vmatprep.subr.bf16.mxu0 %v5134_v12 }
 0x5ed   :  { %2185 = vadd.xlane.f32.xlu0 %v2184_v53 }
 0x676   :  { %v2005_v62 = vpop.xlane.xlu0 %2004 }
 0x677   :  { %v2006_v63 = vmul.f32 0.03125, %v2005_v62 }
 0x679   :  { %v2007_v1 = vsub.f32 %v5685_v47, %v2006_v63 }
 0x67a   :  { %v2186_v7 = vpop.xlane.xlu0 %2185 }
 0x67b   :  { %v2008_v0 = vmul.f32 %v2007_v1, %v2007_v1  ;;  %v2187_v8 = vmul.f32 0.03125, %v2186_v7 }
 0x67d   :  { %v2009_v14 = vsel %vm125_vm0, %v2008_v0, 0.0  ;;  %v2188_v16 = vsub.f32 %v5690_v51, %v2187_v8 }
 0x67e   :  { %2010 = vadd.xlane.f32.xlu1 %v2009_v14 }
 0x67f   :  { %v2189_v24 = vmul.f32 %v2188_v16, %v2188_v16 }
 0x681   :  { %v2190_v25 = vsel %vm125_vm0, %v2189_v24, 0.0 }
 0x682   :  { %2191 = vadd.xlane.f32.xlu1 %v2190_v25 }
 0x70b   :  { %v2011_v50 = vpop.xlane.xlu1 %2010 }
 0x70c   :  { %v2012_v57 = vmul.f32 0.03125, %v2011_v50 }
 0x70e   :  { %v2013_v53 = vadd.f32 1e-05, %v2012_v57 }
 0x70f   :  { %v2192_v62 = vpop.xlane.xlu1 %2191 }
 0x710   :  { %5084 = vrsqrt.f32 %v2013_v53  ;;  %v2193_v63 = vmul.f32 0.03125, %v2192_v62 }
 0x712   :  { %v2194_v7 = vadd.f32 1e-05, %v2193_v63 }
 0x714   :  { %5086 = vrsqrt.f32 %v2194_v7 }
 0x71a   :  { %v5085_v0 = vpop.eup %5084 }
 0x71b   :  { %v2015_v8 = vmul.f32 %v5085_v0, %v2007_v1 }
 0x71d   :  { %4637 = vmatmul.mubr.msk.f32.vlgmr.msra.gmra.mrb[26].mxu0 %vm125_vm0, %v2015_v8 }
 0x71e   :  { %v5087_v14 = vpop.eup %5086  ;;  %4972 = vmatpush3.bf16.msra.mxu0 %v5228_v10  ;;  %4666 = vmatprep.mubr.msk.f32.mxu0 %vm5135_vm1, %v5136_v20  ;;  %v115_v10 = vld [vmem:[%s6012_s11] sm:$0xff] }
 0x71f   :  { %4973 = vmatprep.subr.bf16.mxu0 %v5134_v12  ;;  %v5725_v24 = vmul.f32 %v5087_v14, %v2188_v16 }
 0x722   :  { %4975 = vmatpush3.bf16.msra.mxu0 %v5250_v17 }
 0x723   :  { %4976 = vmatprep.subr.bf16.mxu0 %v5134_v12 }
 0x725   :  { %4667 = vmatmul.mubr.msk.f32.vlgmr.msra.gmra.mrb[28].mxu0 %vm125_vm0, %v5725_v24 }
 0x726   :  { %4978 = vmatpush3.bf16.msra.mxu0 %v5235_v13  ;;  %4677 = vmatprep.mubr.msk.f32.mxu0 %vm5135_vm1, %v5136_v20  ;;  %v116_v13 = vld [vmem:[%s6012_s11 + $0x8] sm:$0xff] }
 0x727   :  { %4979 = vmatprep.subr.bf16.mxu0 %v5134_v12  ;;  %v5787_v17 = vpack.c.bf16 %v116_v13, %v115_v10 }
 0x729   :  { %4960 = vmatpush3.bf16.msra.mxu1 %v5787_v17 }
 0x72a   :  { %4981 = vmatpush3.bf16.msra.mxu0 %v5255_v19  ;;  %4961 = vmatprep.subr.bf16.mxu1 %v5134_v12  ;;  %v117_v19 = vld [vmem:[%s6012_s11 + $0x10] sm:$0xff] }
 0x72b   :  { %4988 = vmatprep.subr.bf16.mxu0 %v5134_v12 }
 0x72d   :  { %4678 = vmatmul.mubr.msk.f32.vlgmr.msra.gmra.mrb[30].mxu0 %vm125_vm0, %v5725_v24 }
 0x72e   :  { %4990 = vmatpush3.bf16.msra.mxu0 %v5279_v30  ;;  %4699 = vmatprep.mubr.msk.f32.mxu0 %vm5135_vm1, %v5136_v20  ;;  %v118_v30 = vld [vmem:[%s6012_s11 + $0x18] sm:$0xff] }
 0x72f   :  { %4991 = vmatprep.subr.bf16.mxu0 %v5134_v12 }
 0x732   :  { %4993 = vmatpush3.bf16.msra.mxu0 %v5303_v37  ;;  %v5797_v37 = vpack.c.bf16 %v118_v30, %v117_v19 }
 0x733   :  { %5000 = vmatprep.subr.bf16.mxu0 %v5134_v12 }
 0x734   :  { %4963 = vmatpush3.bf16.msra.mxu1 %v5797_v37 }
 0x735   :  { %4700 = vmatmul.mubr.msk.f32.vlgmr.msra.gmra.mrb[32].mxu0 %vm125_vm0, %v5725_v24  ;;  %4964 = vmatprep.subr.bf16.mxu1 %v5134_v12 }
 0x736   :  { %5002 = vmatpush3.bf16.msra.mxu0 %v5327_v43  ;;  %4721 = vmatprep.mubr.msk.f32.mxu0 %vm5135_vm1, %v5136_v20  ;;  %v119_v43 = vld [vmem:[%s6012_s11 + $0x20] sm:$0xff] }
 0x737   :  { %5003 = vmatprep.subr.bf16.mxu0 %v5134_v12 }
 0x73a   :  { %5005 = vmatpush3.bf16.msra.mxu0 %v5351_v49  ;;  %v120_v49 = vld [vmem:[%s6012_s11 + $0x28] sm:$0xff] }
 0x73b   :  { %5012 = vmatprep.subr.bf16.mxu0 %v5134_v12 }
 0x73d   :  { %4722 = vmatmul.mubr.msk.f32.vlgmr.msra.gmra.mrb[34].mxu0 %vm125_vm0, %v5725_v24 }
 0x73e   :  { %5014 = vmatpush3.bf16.msra.mxu0 %v5375_v55  ;;  %4743 = vmatprep.mubr.msk.f32.mxu0 %vm5135_vm1, %v5136_v20  ;;  %v5807_v55 = vpack.c.bf16 %v120_v49, %v119_v43 }
 0x73f   :  { %5015 = vmatprep.subr.bf16.mxu0 %v5134_v12 }
 0x740   :  { %4966 = vmatpush3.bf16.msra.mxu1 %v5807_v55 }
 0x741   :  { %4967 = vmatprep.subr.bf16.mxu1 %v5134_v12 }
 0x742   :  { %5017 = vmatpush3.bf16.msra.mxu0 %v5399_v61  ;;  %v121_v61 = vld [vmem:[%s6012_s11 + $0x30] sm:$0xff] }
 0x743   :  { %5024 = vmatprep.subr.bf16.mxu0 %v5134_v12 }
 0x745   :  { %4744 = vmatmul.mubr.msk.f32.vlgmr.msra.gmra.mrb[36].mxu0 %vm125_vm0, %v5725_v24 }
 0x746   :  { %5026 = vmatpush3.bf16.msra.mxu0 %v5423_v4  ;;  %4765 = vmatprep.mubr.msk.f32.mxu0 %vm5135_vm1, %v5136_v20  ;;  %v122_v4 = vld [vmem:[%s6012_s11 + $0x38] sm:$0xff] }
 0x747   :  { %5027 = vmatprep.subr.bf16.mxu0 %v5134_v12 }
 0x74a   :  { %5029 = vmatpush3.bf16.msra.mxu0 %v5447_v11  ;;  %v5817_v11 = vpack.c.bf16 %v122_v4, %v121_v61 }
 0x74b   :  { %5036 = vmatprep.subr.bf16.mxu0 %v5134_v12 }
 0x74c   :  { %4969 = vmatpush3.bf16.msra.mxu1 %v5817_v11 }
 0x74d   :  { %4766 = vmatmul.mubr.msk.f32.vlgmr.msra.gmra.mrb[38].mxu0 %vm125_vm0, %v5725_v24  ;;  %4982 = vmatprep.subr.bf16.mxu1 %v5134_v12 }
 0x74e   :  { %5038 = vmatpush3.bf16.msra.mxu0 %v5471_v22  ;;  %4787 = vmatprep.mubr.msk.f32.mxu0 %vm5135_vm1, %v5136_v20  ;;  %v5824_v22 = vld [vmem:[%s6011_s10] ss:$0 sm:$0xff] }
 0x74f   :  { %5039 = vmatprep.subr.bf16.mxu0 %v5134_v12 }
 0x752   :  { %5041 = vmatpush3.bf16.msra.mxu0 %v5495_v28 }
 0x753   :  { %4800 = vmatprep.subr.mxu0 %v5136_v20 }
 0x755   :  { %4788 = vmatmul.mubr.msk.f32.vlgmr.msra.gmra.mrb[40].mxu0 %vm125_vm0, %v5725_v24 }
 0x756   :  { %4802 = vmatprep.mubr.msk.f32.mxu0 %vm5135_vm1, %v5136_v20 }
 0x7f0   :  { %v2091_v28 = vpop.f32.mrb[26].mxu0 }
 0x7f1   :  { %v2092_v1 = vadd.f32 %v5824_v22, %v2091_v28  ;;  %v4638_v16 = vpop.f32.mrb[27].mxu0 }
 0x7f3   :  { %v2096_v25 = vmul.f32 0.70710677, %v2092_v1  ;;  %v2095_v32 = vmul.f32 0.5, %v2092_v1 }
 0x7f5   :  { %5088 = verf.f32 %v2096_v25 }
 0x7f8   :  { %v5827_v35 = vpop.f32.mrb[28].mxu0 }
 0x7f9   :  { %v4668_v26 = vpop.f32.mrb[29].mxu0  ;;  %v2267_v43 = vadd.f32 %v5523_v46, %v5827_v35 }
 0x7ff   :  { %v5089_v31 = vpop.eup %5088 }
 0x800   :  { %v2098_v50 = vadd.f32 1.0, %v5089_v31  ;;  %v5829_v57 = vpop.f32.mrb[30].mxu0 }
 0x801   :  { %v4679_v53 = vpop.f32.mrb[31].mxu0 }
 0x802   :  { %v2099_v62 = vmul.f32 %v2098_v50, %v2095_v32 }
 0x804   :  { %4656 = vmatmul.mubr.msk.f32.vlgmr.msra.gmra.mrb[22].mxu1 %vm2106_vm3, %v2099_v62 }
 0x805   :  { %4984 = vmatpush3.bf16.msra.mxu1 %v5277_v29  ;;  %4688 = vmatprep.mubr.msk.f32.mxu1 %vm5135_vm1, %v5136_v20 }
 0x806   :  { %4985 = vmatprep.subr.bf16.mxu1 %v5134_v12 }
 0x808   :  { %v5836_v63 = vpop.f32.mrb[32].mxu0 }
 0x809   :  { %4987 = vmatpush3.bf16.msra.mxu1 %v5301_v36  ;;  %v4701_v7 = vpop.f32.mrb[33].mxu0 }
 0x80a   :  { %4994 = vmatprep.subr.bf16.mxu1 %v5134_v12 }
 0x80c   :  { %4689 = vmatmul.mubr.msk.f32.vlgmr.msra.gmra.mrb[24].mxu1 %vm125_vm0, %v5725_v24 }
 0x80d   :  { %4996 = vmatpush3.bf16.msra.mxu1 %v5325_v42  ;;  %4710 = vmatprep.mubr.msk.f32.mxu1 %vm5135_vm1, %v5136_v20 }
 0x80e   :  { %4997 = vmatprep.subr.bf16.mxu1 %v5134_v12 }
 0x810   :  { %v2616_v29 = vpop.f32.mrb[34].mxu0 }
 0x811   :  { %4999 = vmatpush3.bf16.msra.mxu1 %v5349_v48  ;;  %v4723_v0 = vpop.f32.mrb[35].mxu0  ;;  %v2617_v49 = vadd.f32 %v5529_v52, %v2616_v29  ;;  %v2477_v52 = vadd.f32 %v5564_v5, %v5836_v63 }
 0x812   :  { %5006 = vmatprep.subr.bf16.mxu1 %v5134_v12 }
 0x814   :  { %4711 = vmatmul.mubr.msk.f32.vlgmr.msra.gmra.mrb[26].mxu1 %vm125_vm0, %v5725_v24 }
 0x815   :  { %5008 = vmatpush3.bf16.msra.mxu1 %v5373_v54  ;;  %4732 = vmatprep.mubr.msk.f32.mxu1 %vm5135_vm1, %v5136_v20 }
 0x816   :  { %5009 = vmatprep.subr.bf16.mxu1 %v5134_v12 }
 0x818   :  { %v2756_v36 = vpop.f32.mrb[36].mxu0 }
 0x819   :  { %5011 = vmatpush3.bf16.msra.mxu1 %v5397_v60  ;;  %v4745_v42 = vpop.f32.mrb[37].mxu0  ;;  %v2757_v61 = vadd.f32 %v5549_v59, %v2756_v36 }
 0x81a   :  { %5018 = vmatprep.subr.bf16.mxu1 %v5134_v12 }
 0x81c   :  { %4733 = vmatmul.mubr.msk.f32.vlgmr.msra.gmra.mrb[28].mxu1 %vm125_vm0, %v5725_v24 }
 0x81d   :  { %5020 = vmatpush3.bf16.msra.mxu1 %v5421_v3  ;;  %4754 = vmatprep.mubr.msk.f32.mxu1 %vm5135_vm1, %v5136_v20 }
 0x81e   :  { %5021 = vmatprep.subr.bf16.mxu1 %v5134_v12 }
 0x820   :  { %v2896_v48 = vpop.f32.mrb[38].mxu0 }
 0x821   :  { %5023 = vmatpush3.bf16.msra.mxu1 %v5445_v9  ;;  %v4767_v54 = vpop.f32.mrb[39].mxu0  ;;  %v5881_v9 = vld [vmem:[%s6013_s12] ss:$0 sm:$0xff]  ;;  %s5137_s12 = smov [#allocation2]  }
 0x822   :  { %5030 = vmatprep.subr.bf16.mxu1 %v5134_v12  ;;  %s4153_s24 = sshll.u32 %s5137_s12, 4  ;;  %s4154_s24 = int_to_ptr.vmem [resolvable:$true] %s4153_s24 }
 0x823   :  { %s5110_s0 = scalar_lea.vmem %s4154_s24, 256  ;;  %p5115_p1 = scmp.lt.s32.totalorder %s4154_s24, %s4154_s24 }
 0x824   :  { %4755 = vmatmul.mubr.msk.f32.vlgmr.msra.gmra.mrb[30].mxu1 %vm125_vm0, %v5725_v24  ;;  %p5111_p0 = scmp.ne.s32.totalorder %s4154_s24, %s5110_s0  ;;  %p5116_p2 = scmp.lt.s32.totalorder %s5110_s0, %s5110_s0 }
 0x825   :  { %5032 = vmatpush3.bf16.msra.mxu1 %v5469_v21  ;;  %4776 = vmatprep.mubr.msk.f32.mxu1 %vm5135_vm1, %v5136_v20 }
 0x826   :  { %5033 = vmatprep.subr.bf16.mxu1 %v5134_v12  ;;  %p5117_p3 = por %p5116_p2, %p5115_p1 }
 0x828   :  { %v5870_v60 = vpop.f32.mrb[40].mxu0  ;;  %p5118_p4 = pnand %p5117_p3, %p5111_p0 }
 0x829   :  { %5035 = vmatpush3.bf16.msra.mxu1 %v5493_v27  ;;  %v4789_v3 = vpop.f32.mrb[41].mxu0 }
 0x82a   :  { %4790 = vmatprep.subr.mxu1 %v5136_v20 }
 0x82c   :  { %4777 = vmatmul.mubr.msk.f32.vlgmr.msra.gmra.mrb[32].mxu1 %vm125_vm0, %v5725_v24 }
 0x82d   :  { %4792 = vmatprep.mubr.msk.f32.mxu1 %vm5135_vm1, %v5136_v20 }
 0x8d7   :  { %v2176_v21 = vpop.f32.mrb[22].mxu1 }
 0x8d8   :  { %v2177_v8 = vadd.f32 %v5881_v9, %v2176_v21  ;;  %v4657_v14 = vpop.f32.mrb[23].mxu1 }
 0x8da   :  { %v2180_v27 = vadd.f32 %v2177_v8, %v5685_v47 }
 0x8dc   :  { %2181 = vst.msk [vmem:[#allocation2] sm:$0xff] %vm125_vm0, %v2180_v27 }
 0x8df   :  { %v2406_v10 = vpop.f32.mrb[24].mxu1 }
 0x8e0   :  { %v4690_v13 = vpop.f32.mrb[25].mxu1  ;;  %v2407_v28 = vadd.f32 %v5559_v2, %v2406_v10 }
 0x8e7   :  { %v2546_v19 = vpop.f32.mrb[26].mxu1 }
 0x8e8   :  { %v2547_v24 = vadd.f32 %v5518_v44, %v2546_v19  ;;  %v4712_v30 = vpop.f32.mrb[27].mxu1  ;;  %v2337_v44 = vadd.f32 %v5537_v56, %v5829_v57  ;;  %v2897_v56 = vadd.f32 %v5587_v23, %v2896_v48 }
 0x8ea   :  { %4791 = vmatpush3.xpose.msk.msra.mxu1 %vm1055_vm2, %v2547_v24 }
 0x8eb   :  { %4795 = vmatprep.subr.mxu1 %v5136_v20 }
 0x8ed   :  { %4793 = vmatmul.mubr.msk.f32.vlgmr.msra.gmra.mrb[34].mxu1 %vm1055_vm2, %v2267_v43 }
 0x8ee   :  { %4796 = vmatpush3.xpose.msk.msra.mxu1 %vm1055_vm2, %v2617_v49  ;;  %4797 = vmatprep.mubr.msk.f32.mxu1 %vm5135_vm1, %v5136_v20 }
 0x8ef   :  { %v2686_v47 = vpop.f32.mrb[28].mxu1  ;;  %4805 = vmatprep.subr.mxu1 %v5136_v20 }
 0x8f0   :  { %v2687_v46 = vadd.f32 %v5544_v58, %v2686_v47  ;;  %v4734_v4 = vpop.f32.mrb[29].mxu1 }
 0x8f1   :  { %4798 = vmatmul.mubr.msk.f32.vlgmr.msra.gmra.mrb[36].mxu1 %vm1055_vm2, %v2337_v44 }
 0x8f2   :  { %4801 = vmatpush3.xpose.msk.msra.mxu0 %vm1055_vm2, %v2687_v46  ;;  %4806 = vmatpush3.xpose.msk.msra.mxu1 %vm1055_vm2, %v2757_v61 }
 0x8f3   :  { %4807 = vmatprep.mubr.msk.f32.mxu1 %vm5135_vm1, %v5136_v20  ;;  %4815 = vmatprep.subr.mxu1 %v5136_v20 }
 0x8f4   :  { %4810 = vmatprep.subr.mxu0 %v5136_v20 }
 0x8f5   :  { %4803 = vmatmul.mubr.msk.f32.vlgmr.msra.gmra.mrb[42].mxu0 %vm1055_vm2, %v2407_v28  ;;  %4808 = vmatmul.mubr.msk.f32.vlgmr.msra.gmra.mrb[38].mxu1 %vm1055_vm2, %v2477_v52 }
 0x8f6   :  { %4816 = vmatpush3.msra.mxu1 %v2897_v56  ;;  %4812 = vmatprep.mubr.msk.f32.mxu0 %vm5135_vm1, %v5136_v20 }
 0x8f7   :  { %v2826_v58 = vpop.f32.mrb[30].mxu1  ;;  %4817 = vmatprep.mubr.msk.f32.mxu1 %vm5135_vm1, %v5136_v20  ;;  %4825 = vmatprep.subr.mxu1 %v5136_v20 }
 0x8f8   :  { %v2827_v59 = vadd.f32 %v5582_v18, %v2826_v58  ;;  %v4756_v2 = vpop.f32.mrb[31].mxu1 }
 0x8fa   :  { %4811 = vmatpush3.msra.mxu0 %v2827_v59  ;;  %v3037_v59 = vadd.f32 %v5616_v15, %v5870_v60 }
 0x8fb   :  { %4820 = vmatprep.subr.mxu0 %v5136_v20 }
 0x8ff   :  { %v2966_v5 = vpop.f32.mrb[32].mxu1 }
 0x900   :  { %v4778_v23 = vpop.f32.mrb[33].mxu1  ;;  %v2967_v28 = vadd.f32 %v5610_v6, %v2966_v5 }
 0x9c0   :  { %v3112_v1 = vpop.f32.mrb[34].mxu1 }
 0x9c1   :  { %v4794_v16 = vpop.f32.mrb[35].mxu1  ;;  %v3344_v25 = vsel %vm1055_vm2, %v3112_v1, -inf }
 0x9c2   :  { %3345 = vmax.xlane.f32.xlu0 %v3344_v25 }
 0x9c4   :  { %v3188_v35 = vpop.f32.mrb[36].mxu1 }
 0x9c5   :  { %v4799_v26 = vpop.f32.mrb[37].mxu1  ;;  %v3347_v31 = vsel %vm1055_vm2, %v3188_v35, -inf }
 0x9c6   :  { %3348 = vmax.xlane.f32.xlu1 %v3347_v31 }
 0x9c8   :  { %v3264_v32 = vpop.f32.mrb[42].mxu0  ;;  %v3340_v50 = vpop.f32.mrb[38].mxu1 }
 0x9c9   :  { %v4804_v57 = vpop.f32.mrb[43].mxu0  ;;  %v4809_v18 = vpop.f32.mrb[39].mxu1  ;;  %v3353_v53 = vsel %vm1055_vm2, %v3340_v50, -inf  ;;  %v3350_v62 = vsel %vm1055_vm2, %v3264_v32, -inf }
 0x9ca   :  { %3354 = vmax.xlane.f32.xlu1 %v3353_v53  ;;  %3351 = vmax.xlane.f32.xlu0 %v3350_v62 }
 0xa4f   :  { %v3346_v63 = vpop.xlane.xlu0 %3345 }
 0xa50   :  { %v3356_v7 = vsub.f32 %v3112_v1, %v3346_v63 }
 0xa52   :  { %v3360_v29 = vmul.f32 1.442695, %v3356_v7 }
 0xa53   :  { %v3349_v0 = vpop.xlane.xlu1 %3348 }
 0xa54   :  { %5090 = vpow2.f32 %v3360_v29  ;;  %v3357_v36 = vsub.f32 %v3188_v35, %v3349_v0 }
 0xa56   :  { %v3362_v42 = vmul.f32 1.442695, %v3357_v36 }
 0xa57   :  { %v3355_v48 = vpop.xlane.xlu1 %3354  ;;  %v3352_v54 = vpop.xlane.xlu0 %3351 }
 0xa58   :  { %5092 = vpow2.f32 %v3362_v42  ;;  %v3359_v3 = vsub.f32 %v3340_v50, %v3355_v48  ;;  %v3358_v21 = vsub.f32 %v3264_v32, %v3352_v54 }
 0xa5a   :  { %v3366_v8 = vmul.f32 1.442695, %v3359_v3  ;;  %v3364_v14 = vmul.f32 1.442695, %v3358_v21 }
 0xa5c   :  { %5094 = vpow2.f32 %v3366_v8 }
 0xa5d   :  { %5096 = vpow2.f32 %v3364_v14 }
 0xa5e   :  { %v5091_v27 = vpop.eup %5090 }
 0xa5f   :  { %v3368_v10 = vsel %vm1055_vm2, %v5091_v27, 0.0 }
 0xa60   :  { %3369 = vadd.xlane.f32.xlu0 %v3368_v10 }
 0xa62   :  { %v5093_v13 = vpop.eup %5092 }
 0xa63   :  { %v3371_v19 = vsel %vm1055_vm2, %v5093_v13, 0.0 }
 0xa64   :  { %3372 = vadd.xlane.f32.xlu1 %v3371_v19 }
 0xa66   :  { %v5095_v24 = vpop.eup %5094 }
 0xa67   :  { %v5097_v30 = vpop.eup %5096  ;;  %v3377_v43 = vsel %vm1055_vm2, %v5095_v24, 0.0 }
 0xa68   :  { %3378 = vadd.xlane.f32.xlu1 %v3377_v43  ;;  %v3374_v49 = vsel %vm1055_vm2, %v5097_v30, 0.0 }
 0xa69   :  { %3375 = vadd.xlane.f32.xlu0 %v3374_v49 }
 0xaed   :  { %v3370_v44 = vpop.xlane.xlu0 %3369 }
 0xaee   :  { %5098 = vrcp.f32 %v3370_v44 }
 0xaf1   :  { %v3373_v47 = vpop.xlane.xlu1 %3372 }
 0xaf2   :  { %5100 = vrcp.f32 %v3373_v47 }
 0xaf5   :  { %v3379_v61 = vpop.xlane.xlu1 %3378 }
 0xaf6   :  { %5102 = vrcp.f32 %v3379_v61  ;;  %v3376_v46 = vpop.xlane.xlu0 %3375 }
 0xaf7   :  { %5104 = vrcp.f32 %v3376_v46 }
 0xaf8   :  { %v5099_v4 = vpop.eup %5098 }
 0xaf9   :  { %v3384_v52 = vmul.f32 %v5099_v4, %v5091_v27 }
 0xafb   :  { %4813 = vmatmul.mubr.msk.f32.vlgmr.msra.gmra.mrb[44].mxu0 %vm1055_vm2, %v3384_v52 }
 0xafc   :  { %v5101_v56 = vpop.eup %5100  ;;  %4821 = vmatpush3.msra.mxu0 %v2967_v28  ;;  %4822 = vmatprep.mubr.msk.f32.mxu0 %vm5135_vm1, %v5136_v20 }
 0xafd   :  { %v3385_v58 = vmul.f32 %v5101_v56, %v5093_v13  ;;  %4830 = vmatprep.subr.mxu0 %v5136_v20 }
 0xaff   :  { %4818 = vmatmul.mubr.msk.f32.vlgmr.msra.gmra.mrb[40].mxu1 %vm1055_vm2, %v3385_v58 }
 0xb00   :  { %v5103_v2 = vpop.eup %5102  ;;  %4826 = vmatpush3.msra.mxu1 %v3037_v59  ;;  %4827 = vmatprep.mubr.msk.f32.mxu1 %vm5135_vm1, %v5136_v20 }
 0xb01   :  { %v5105_v6 = vpop.eup %5104  ;;  %v3387_v5 = vmul.f32 %v5103_v2, %v5095_v24  ;;  %4835 = vmatprep.subr.mxu1 %v5136_v20 }
 0xb02   :  { %v3386_v23 = vmul.f32 %v5105_v6, %v5097_v30 }
 0xb03   :  { %4828 = vmatmul.mubr.msk.f32.vlgmr.msra.gmra.mrb[42].mxu1 %vm1055_vm2, %v3387_v5 }
 0xb04   :  { %4823 = vmatmul.mubr.msk.f32.vlgmr.msra.gmra.mrb[46].mxu0 %vm1055_vm2, %v3386_v23  ;;  %4836 = vmatpush3.msra.mxu1 %v5644_v34 }
 0xb05   :  { %4831 = vmatpush3.msra.mxu0 %v5637_v38  ;;  %4832 = vmatprep.mubr.msk.f32.mxu0 %vm5135_vm1, %v5136_v20 }
 0xb06   :  { %4837 = vmatprep.mubr.msk.f32.mxu1 %vm5135_vm1, %v5136_v20  ;;  %4840 = vmatprep.subr.mxu0 %v5136_v20 }
 0xb07   :  { %4845 = vmatprep.subr.mxu1 %v5136_v20 }
 0xbce   :  { %v3457_v15 = vpop.f32.mrb[44].mxu0 }
 0xbcf   :  { %v4814_v60 = vpop.f32.mrb[45].mxu0  ;;  %4833 = vmatmul.mubr.msk.f32.vlgmr.msra.gmra.mrb[48].mxu0 %vm1055_vm2, %v3457_v15 }
 0xbd0   :  { %4841 = vmatpush3.msra.mxu0 %v5651_v39  ;;  %4842 = vmatprep.mubr.msk.f32.mxu0 %vm5135_vm1, %v5136_v20 }
 0xbd1   :  { %5042 = vmatprep.subr.bf16.mxu0 %v5134_v12 }
 0xbd2   :  { %v3530_v38 = vpop.f32.mrb[40].mxu1 }
 0xbd3   :  { %v4819_v34 = vpop.f32.mrb[41].mxu1  ;;  %4838 = vmatmul.mubr.msk.f32.vlgmr.msra.gmra.mrb[44].mxu1 %vm1055_vm2, %v3530_v38 }
 0xbd4   :  { %4846 = vmatpush3.msra.mxu1 %v5660_v45  ;;  %4847 = vmatprep.mubr.msk.f32.mxu1 %vm5135_vm1, %v5136_v20 }
 0xbd5   :  { %5048 = vmatprep.subr.bf16.mxu1 %v5134_v12 }
 0xbd6   :  { %v3676_v1 = vpop.f32.mrb[42].mxu1 }
 0xbd7   :  { %v3603_v16 = vpop.f32.mrb[46].mxu0  ;;  %v4829_v25 = vpop.f32.mrb[43].mxu1  ;;  %4848 = vmatmul.mubr.msk.f32.vlgmr.msra.gmra.mrb[46].mxu1 %vm1055_vm2, %v3676_v1 }
 0xbd8   :  { %v4824_v39 = vpop.f32.mrb[47].mxu0  ;;  %4843 = vmatmul.mubr.msk.f32.vlgmr.msra.gmra.mrb[50].mxu0 %vm1055_vm2, %v3603_v16  ;;  %5050 = vmatpush3.bf16.msra.mxu1 %v5787_v17 }
 0xbd9   :  { %5044 = vmatpush3.bf16.msra.mxu0 %v5709_v33  ;;  %4858 = vmatprep.mubr.msk.f32.mxu0 %vm5135_vm1, %v5136_v20 }
 0xbda   :  { %5045 = vmatprep.subr.bf16.mxu0 %v5134_v12  ;;  %5051 = vmatprep.subr.bf16.mxu1 %v5134_v12 }
 0xbdb   :  { %4877 = vmatprep.mubr.msk.f32.mxu1 %vm5135_vm1, %v5136_v20 }
 0xbdc   :  { %5053 = vmatpush3.bf16.msra.mxu1 %v5797_v37 }
 0xbdd   :  { %5047 = vmatpush3.bf16.msra.mxu0 %v5715_v41  ;;  %5054 = vmatprep.subr.bf16.mxu1 %v5134_v12 }
 0xbe0   :  { %5056 = vmatpush3.bf16.msra.mxu1 %v5807_v55 }
 0xbe1   :  { %5057 = vmatprep.subr.bf16.mxu1 %v5134_v12 }
 0xbe4   :  { %5059 = vmatpush3.bf16.msra.mxu1 %v5817_v11 }
 0xca2   :  { %v3749_v45 = vpop.f32.mrb[48].mxu0 }
 0xca3   :  { %v4834_v33 = vpop.f32.mrb[49].mxu0  ;;  %v3972_v35 = vsel %vm125_vm0, %v3749_v45, 0.0 }
 0xca6   :  { %v3822_v17 = vpop.f32.mrb[44].mxu1 }
 0xca7   :  { %v3973_v26 = vsel %vm125_vm0, %v3822_v17, 0.0  ;;  %v4839_v20 = vpop.f32.mrb[45].mxu1 }
 0xca8   :  { %v3974_v31 = vadd.f32 %v3973_v26, %v3972_v35 }
 0xcaa   :  { %v3968_v37 = vpop.f32.mrb[46].mxu1 }
 0xcab   :  { %v3895_v32 = vpop.f32.mrb[50].mxu0  ;;  %v4849_v41 = vpop.f32.mrb[47].mxu1  ;;  %v3977_v12 = vsel %vm125_vm0, %v3968_v37, 0.0 }
 0xcac   :  { %v3975_v50 = vsel %vm125_vm0, %v3895_v32, 0.0  ;;  %v4844_v57 = vpop.f32.mrb[51].mxu0 }
 0xcad   :  { %v3976_v55 = vadd.f32 %v3975_v50, %v3974_v31 }
 0xcaf   :  { %v3978_v18 = vadd.f32 %v3977_v12, %v3976_v55 }
 0xcb1   :  { %v3979_v11 = vadd.f32 %v5680_v40, %v3978_v18 }
 0xcb3   :  { %v3980_v53 = vadd.f32 %v5690_v51, %v3979_v11 }
 0xcb5   :  { %v3981_v62 = vsel %vm125_vm0, %v3980_v53, 0.0 }
 0xcb6   :  { %3982 = vadd.xlane.f32.xlu0 %v3981_v62 }
 0xd43   :  { %v3983_v63 = vpop.xlane.xlu0 %3982 }
 0xd44   :  { %v3984_v7 = vmul.f32 0.03125, %v3983_v63 }
 0xd46   :  { %v3985_v29 = vsub.f32 %v3980_v53, %v3984_v7 }
 0xd48   :  { %v3986_v0 = vmul.f32 %v3985_v29, %v3985_v29 }
 0xd4a   :  { %v3987_v36 = vsel %vm125_vm0, %v3986_v0, 0.0 }
 0xd4b   :  { %3988 = vadd.xlane.f32.xlu1 %v3987_v36 }
 0xdd8   :  { %v3989_v42 = vpop.xlane.xlu1 %3988 }
 0xdd9   :  { %v3990_v48 = vmul.f32 0.03125, %v3989_v42 }
 0xddb   :  { %v3991_v54 = vadd.f32 1e-05, %v3990_v48 }
 0xddd   :  { %5106 = vrsqrt.f32 %v3991_v54 }
 0xde7   :  { %v5107_v3 = vpop.eup %5106 }
 0xde8   :  { %v3993_v21 = vmul.f32 %v5107_v3, %v3985_v29 }
 0xdea   :  { %4859 = vmatmul.mubr.msk.f32.vlgmr.msra.gmra.mrb[52].mxu0 %vm125_vm0, %v3993_v21 }
 0xebd   :  { %v4063_v40 = vpop.f32.mrb[52].mxu0 }
 0xebe   :  { %v4064_v51 = vadd.f32 %v5824_v22, %v4063_v40  ;;  %v4860_v8 = vpop.f32.mrb[53].mxu0 }
 0xec0   :  { %v4068_v14 = vmul.f32 0.70710677, %v4064_v51  ;;  %v4067_v10 = vmul.f32 0.5, %v4064_v51 }
 0xec2   :  { %5108 = verf.f32 %v4068_v14 }
 0xecc   :  { %v5109_v27 = vpop.eup %5108 }
 0xecd   :  { %v4070_v13 = vadd.f32 1.0, %v5109_v27 }
 0xecf   :  { %v4071_v19 = vmul.f32 %v4070_v13, %v4067_v10 }
 0xed1   :  { %4878 = vmatmul.mubr.msk.f32.vlgmr.msra.gmra.mrb[48].mxu1 %vm2106_vm3, %v4071_v19 }
 0xfa4   :  { %v4141_v24 = vpop.f32.mrb[48].mxu1 }
 0xfa5   :  { %v4142_v30 = vadd.f32 %v5881_v9, %v4141_v24  ;;  %v4879_v43 = vpop.f32.mrb[49].mxu1 }
 0xfa7   :  { %v4145_v49 = vadd.f32 %v4142_v30, %v3980_v53 }
 0xfa9   :  { %4147 = vst.msk [vmem:[#allocation2 + $0x8] sm:$0xff] %vm125_vm0, %v4145_v49 }
 0xfaa   :  { %5121 = shalt.err (!%p5118_p4)
}
 0xfab   :  { %s5122_s26 = scalar_lea.hbm %s6014_s13, 256 }
 0xfac   :  { %p5123_p5 = scmp.ne.s32.totalorder %s6014_s13, %s5122_s26  ;;  %p5126_p6 = scmp.lt.u32.totalorder %s5122_s26, %s6014_s13 }
 0xfae   :  { %p5128_p7 = pnand %p5126_p6, %p5123_p5 }
 0xfb0   :  { %5131 = shalt.err (!%p5128_p7)
}
 0xfb1   :  { %s5138_s9 = smov 128   ;;  %s5139_s28 = smov 8  }
 0xfb2   :  { %4159 = dma.vmem_to_hbm [thread:$0]  %s4154_s24, 256, %s6014_s13, [#allocation3], %s5138_s9, %s5138_s9, %s5139_s28  }
 0xfb3   :  { %5132 = dma.done.wait [#allocation3], 256  }
 0xfb4   :  { %5133 = vsyncadd [#allocation3], 4294967040 }
 0xfb5   :  { %4163 = vsyncpa [#allocation3], 1 }

</bundles_post_ra>
